<compile_context>
chip_gen: v7x
topology: tpu7x:2x2x1
jax: 0.10.0
libtpu: 0.0.40
codegen_flags: <defaults>
</compile_context>

<pallas_src>
import functools
import math

import jax
import jax.numpy as jnp
from jax.experimental import pallas as pl
from jax.experimental.pallas import tpu as pltpu

LN_EPS = 1e-6  # nn.LayerNorm(d_model, eps=1e-6) as in the reference Transformer impl


# ----------------------------------------------------------------------------
# Fused kernel: grid = (batch_shards, n_layers); out_ref is the VMEM-resident
# activation carry across the layer axis.
# ----------------------------------------------------------------------------
def encoder_stack_kernel(
    x_ref,                                              # (Ms, D) input batch shard
    wqkv_ref, bqkv_ref,                                 # fused QKV projection
    wo_ref, bo_ref,                                     # per-head out-proj slabs
    ln1_g_ref, ln1_b_ref,                               # LayerNorm after attention
    w1_ref, b1_ref, w2_ref, b2_ref,                     # position-wise FFN
    ln2_g_ref, ln2_b_ref,                               # LayerNorm after FFN
    out_ref,                                            # (Ms, D) activation carry
    *, n_head, d_k, d_v, seq_len, shard_batch,
):
    layer = pl.program_id(1)

    # Layer 0: seed the VMEM-resident activation with the kernel input.
    @pl.when(layer == 0)
    def _():
        out_ref[...] = x_ref[...]

    x = out_ref[...].astype(jnp.float32)                # (Ms, D)
    xb = x.astype(jnp.bfloat16)
    M, D = x.shape

    # --- Multi-head self attention -------------------------------------------
    # One wide fused QKV matmul per layer (big MXU N), then per-head static
    # lane slices.  1/sqrt(d_k) is already folded into the Q columns.
    qkv = jnp.dot(xb, wqkv_ref[0],
                  preferred_element_type=jnp.float32) + bqkv_ref[0]  # (Ms, H*(2dk+dv))
    k_off = n_head * d_k
    v_off = 2 * n_head * d_k

    wo = wo_ref[0]                                      # bf16 (H, d_v, D)

    attn = jnp.zeros((M, D), jnp.float32)
    for h in range(n_head):                             # static unroll (n_head small)
        qh = qkv[:, h * d_k:(h + 1) * d_k]
        kh = qkv[:, k_off + h * d_k: k_off + (h + 1) * d_k]
        vh = qkv[:, v_off + h * d_v: v_off + (h + 1) * d_v]
        q3 = qh.reshape(shard_batch, seq_len, d_k).astype(jnp.bfloat16)
        k3 = kh.reshape(shard_batch, seq_len, d_k).astype(jnp.bfloat16)
        v3 = vh.reshape(shard_batch, seq_len, d_v).astype(jnp.bfloat16)
        s = jnp.einsum("bqd,bkd->bqk", q3, k3,
                       preferred_element_type=jnp.float32)            # (Bs, L, L)
        s = s - jnp.max(s, axis=-1, keepdims=True)
        p = jnp.exp(s)
        p = p * pl.reciprocal(jnp.sum(p, axis=-1, keepdims=True), approx=True)
        oh = jnp.einsum("bqk,bkd->bqd", p.astype(jnp.bfloat16), v3,
                        preferred_element_type=jnp.float32)            # (Bs, L, dv)
        # Fold head output straight through the output projection (no concat).
        attn = attn + jnp.dot(oh.reshape(M, d_v).astype(jnp.bfloat16), wo[h],
                              preferred_element_type=jnp.float32)

    o = attn + bo_ref[0] + x                                           # bias + residual
    mu = jnp.mean(o, axis=-1, keepdims=True)
    var = jnp.mean((o - mu) * (o - mu), axis=-1, keepdims=True)
    o = (o - mu) * jax.lax.rsqrt(var + LN_EPS) * ln1_g_ref[0] + ln1_b_ref[0]

    # --- Position-wise feed forward -------------------------------------------
    # TODO(synk): for production-scale d_inner the FFN should be K-tiled over an
    # extra grid axis to respect v7x's 64 MiB VMEM; at these sizes it fits whole.
    h1 = jnp.dot(o.astype(jnp.bfloat16), w1_ref[0],
                 preferred_element_type=jnp.float32) + b1_ref[0]
    h1 = jnp.maximum(h1, 0.0)
    h2 = jnp.dot(h1.astype(jnp.bfloat16), w2_ref[0],
                 preferred_element_type=jnp.float32) + b2_ref[0]
    y = h2 + o                                                          # residual
    mu2 = jnp.mean(y, axis=-1, keepdims=True)
    var2 = jnp.mean((y - mu2) * (y - mu2), axis=-1, keepdims=True)
    y = (y - mu2) * jax.lax.rsqrt(var2 + LN_EPS) * ln2_g_ref[0] + ln2_b_ref[0]

    out_ref[...] = y.astype(out_ref.dtype)


# ----------------------------------------------------------------------------
# Wrapper-side parameter prep: stack along layer axis, fuse Wq|Wk|Wv into one
# projection slab, fold 1/sqrt(d_k) into the Q columns, per-head Wo slabs,
# cast matmul weights to bf16.
# ----------------------------------------------------------------------------
def prepare_stacked_params(layer_params, *, n_head, d_k, d_v,
                           matmul_dtype=jnp.bfloat16):
    nl = len(layer_params)
    d_model = layer_params[0]["wq"].shape[0]
    d_inner = layer_params[0]["w1"].shape[1]
    stack = lambda name: jnp.stack([p[name] for p in layer_params])
    scale = 1.0 / math.sqrt(d_k)

    # Fused QKV projection: columns = [Q heads | K heads | V heads].
    wqkv = jnp.concatenate(
        [stack("wq") * scale, stack("wk"), stack("wv")],
        axis=-1).astype(matmul_dtype)                                   # (nl, D, H*(2dk+dv))
    bqkv = jnp.concatenate(
        [stack("bq") * scale, stack("bk"), stack("bv")],
        axis=-1).astype(jnp.float32)                                    # (nl, 1, H*(2dk+dv))

    wo = stack("wo").reshape(nl, n_head, d_v, d_model).astype(matmul_dtype)
    bo = stack("bo").reshape(nl, 1, d_model).astype(jnp.float32)
    w1 = stack("w1").astype(matmul_dtype)
    b1 = stack("b1").reshape(nl, 1, d_inner).astype(jnp.float32)
    w2 = stack("w2").astype(matmul_dtype)
    b2 = stack("b2").reshape(nl, 1, d_model).astype(jnp.float32)
    ln1_g = stack("ln1_g").reshape(nl, 1, d_model).astype(jnp.float32)
    ln1_b = stack("ln1_b").reshape(nl, 1, d_model).astype(jnp.float32)
    ln2_g = stack("ln2_g").reshape(nl, 1, d_model).astype(jnp.float32)
    ln2_b = stack("ln2_b").reshape(nl, 1, d_model).astype(jnp.float32)

    return (wqkv, bqkv, wo, bo, ln1_g, ln1_b, w1, b1, w2, b2, ln2_g, ln2_b)


# ----------------------------------------------------------------------------
# Encoder_image.forward: one fused pallas_call over (batch shards, layers).
# ----------------------------------------------------------------------------
def encoder_image_pallas(x, layer_params, *, n_head, d_k, d_v, num_shards=None):
    B, L, D = x.shape
    n_layers = len(layer_params)
    d_inner = layer_params[0]["w1"].shape[1]

    # Leading "parallel" axis so a second TensorCore has work; batch shards
    # must keep the row block a multiple of the 8-sublane tile.
    if num_shards is None:
        num_shards = 2 if (B % 2 == 0 and ((B // 2) * L) % 8 == 0) else 1
    shard_batch = B // num_shards
    Ms = shard_batch * L

    weights = prepare_stacked_params(layer_params, n_head=n_head, d_k=d_k, d_v=d_v)

    x2d = x.reshape(B * L, D)  # fold batch into the matmul M dimension

    def layer_spec(arr):
        zeros = (0,) * (arr.ndim - 1)
        return pl.BlockSpec((1,) + arr.shape[1:], lambda b, l: (l,) + zeros)

    in_specs = [pl.BlockSpec((Ms, D), lambda b, l: (b, 0))]
    in_specs += [layer_spec(w) for w in weights]

    M = B * L
    flops_per_layer = (
        2 * M * D * n_head * (2 * d_k + d_v)          # fused QKV projection
        + 2 * B * n_head * L * L * (d_k + d_v)        # attention matmuls
        + 2 * M * n_head * d_v * D                    # output projection
        + 4 * M * D * d_inner)                        # FFN
    cost = pl.CostEstimate(
        flops=n_layers * flops_per_layer,
        transcendentals=n_layers * (B * n_head * L * L + 2 * M),
        bytes_accessed=2 * x2d.size * x2d.dtype.itemsize
        + sum(int(w.size) * w.dtype.itemsize for w in weights))

    kernel = functools.partial(encoder_stack_kernel,
                               n_head=n_head, d_k=d_k, d_v=d_v,
                               seq_len=L, shard_batch=shard_batch)

    out2d = pl.pallas_call(
        kernel,
        grid=(num_shards, n_layers),
        in_specs=in_specs,
        out_specs=pl.BlockSpec((Ms, D), lambda b, l: (b, 0)),
        out_shape=jax.ShapeDtypeStruct((B * L, D), x.dtype),
        compiler_params=pltpu.CompilerParams(
            dimension_semantics=("parallel", "arbitrary"),
            vmem_limit_bytes=32 * 1024 * 1024),
        cost_estimate=cost,
    )(x2d, *weights)
    return out2d.reshape(B, L, D)


# ----------------------------------------------------------------------------
# Deterministic synthetic parameters (no checkpoint load).
# ----------------------------------------------------------------------------
def init_layer_params(key, d_model, d_inner, n_head, d_k, d_v):
    ks = jax.random.split(key, 6)
    s = 0.05
    return {
        "wq": s * jax.random.normal(ks[0], (d_model, n_head * d_k), jnp.float32),
        "bq": jnp.zeros((1, n_head * d_k), jnp.float32),
        "wk": s * jax.random.normal(ks[1], (d_model, n_head * d_k), jnp.float32),
        "bk": jnp.zeros((1, n_head * d_k), jnp.float32),
        "wv": s * jax.random.normal(ks[2], (d_model, n_head * d_v), jnp.float32),
        "bv": jnp.zeros((1, n_head * d_v), jnp.float32),
        "wo": s * jax.random.normal(ks[3], (n_head * d_v, d_model), jnp.float32),
        "bo": jnp.zeros((1, d_model), jnp.float32),
        "ln1_g": jnp.ones((1, d_model), jnp.float32),
        "ln1_b": jnp.zeros((1, d_model), jnp.float32),
        "w1": s * jax.random.normal(ks[4], (d_model, d_inner), jnp.float32),
        "b1": jnp.zeros((1, d_inner), jnp.float32),
        "w2": s * jax.random.normal(ks[5], (d_inner, d_model), jnp.float32),
        "b2": jnp.zeros((1, d_model), jnp.float32),
        "ln2_g": jnp.ones((1, d_model), jnp.float32),
        "ln2_b": jnp.zeros((1, d_model), jnp.float32),
    }


# ----------------------------------------------------------------------------
# Pure-JAX f32 reference (mirrors the PyTorch EncoderLayer, eval mode).
# ----------------------------------------------------------------------------
def _layernorm(x, g, b):
    mu = jnp.mean(x, axis=-1, keepdims=True)
    var = jnp.mean((x - mu) ** 2, axis=-1, keepdims=True)
    return (x - mu) * jax.lax.rsqrt(var + LN_EPS) * g + b


def encoder_layer_ref(x, p, *, n_head, d_k, d_v):
    B, L, D = x.shape
    q = (x @ p["wq"] + p["bq"]).reshape(B, L, n_head, d_k).transpose(0, 2, 1, 3)
    k = (x @ p["wk"] + p["bk"]).reshape(B, L, n_head, d_k).transpose(0, 2, 1, 3)
    v = (x @ p["wv"] + p["bv"]).reshape(B, L, n_head, d_v).transpose(0, 2, 1, 3)
    s = jnp.einsum("bhqd,bhkd->bhqk", q, k) / math.sqrt(d_k)
    a = jax.nn.softmax(s, axis=-1)
    o = jnp.einsum("bhqk,bhkd->bhqd", a, v).transpose(0, 2, 1, 3).reshape(B, L, -1)
    o = o @ p["wo"] + p["bo"]
    o = _layernorm(o + x, p["ln1_g"], p["ln1_b"])
    h = jnp.maximum(o @ p["w1"] + p["b1"], 0.0)
    h = h @ p["w2"] + p["b2"]
    return _layernorm(h + o, p["ln2_g"], p["ln2_b"])


def encoder_image_ref(x, layer_params, *, n_head, d_k, d_v):
    for p in layer_params:
        x = encoder_layer_ref(x, p, n_head=n_head, d_k=d_k, d_v=d_v)
    return x


# ----------------------------------------------------------------------------
if __name__ == "__main__":
    # Small config consistent with Encoder_image(n_layers, n_head, d_k, d_v,
    # d_model, d_inner):
    n_layers, n_head, d_k, d_v, d_model, d_inner = 2, 2, 16, 16, 32, 64
    B, L = 2, 8  # batch of 2 sequences of 8 style-image tokens

    root = jax.random.PRNGKey(0)
    key_x, *layer_keys = jax.random.split(root, n_layers + 1)

    x = jax.random.normal(key_x, (B, L, d_model), jnp.float32)
    layer_params = [
        init_layer_params(k, d_model, d_inner, n_head, d_k, d_v)
        for k in layer_keys
    ]

    out = encoder_image_pallas(x, layer_params, n_head=n_head, d_k=d_k, d_v=d_v)
    out = jax.block_until_ready(out)

    ref = encoder_image_ref(x, layer_params, n_head=n_head, d_k=d_k, d_v=d_v)
    assert out.shape == (B, L, d_model)
    # bf16 matmuls + approximate softmax reciprocal vs. the f32 reference.
    err = float(jnp.max(jnp.abs(out - ref)))
    assert jnp.allclose(out, ref, atol=5e-2, rtol=5e-2), f"max abs err {err}"

    # TODO(synk): dropout layers are identity here (eval-mode semantics); the
    # PyTorch module's training-mode dropout RNG is not reproduced.
    print("KERNEL_OK")
</pallas_src>

<mosaic_0001>
module attributes {stable_mosaic.version = 11 : i64} {
  func.func @encoder_stack_kernel(%arg0: i32, %arg1: i32, %arg2: memref<8x32xf32, #tpu.memory_space<vmem>>, %arg3: memref<1x32x96xbf16, #tpu.memory_space<vmem>>, %arg4: memref<1x1x96xf32, #tpu.memory_space<vmem>>, %arg5: memref<1x2x16x32xbf16, #tpu.memory_space<vmem>>, %arg6: memref<1x1x32xf32, #tpu.memory_space<vmem>>, %arg7: memref<1x1x32xf32, #tpu.memory_space<vmem>>, %arg8: memref<1x1x32xf32, #tpu.memory_space<vmem>>, %arg9: memref<1x32x64xbf16, #tpu.memory_space<vmem>>, %arg10: memref<1x1x64xf32, #tpu.memory_space<vmem>>, %arg11: memref<1x64x32xbf16, #tpu.memory_space<vmem>>, %arg12: memref<1x1x32xf32, #tpu.memory_space<vmem>>, %arg13: memref<1x1x32xf32, #tpu.memory_space<vmem>>, %arg14: memref<1x1x32xf32, #tpu.memory_space<vmem>>, %arg15: memref<8x32xf32, #tpu.memory_space<vmem>>) attributes {dimension_semantics = [#tpu.dimension_semantics<parallel>, #tpu.dimension_semantics<arbitrary>], iteration_bounds = array<i64: 2, 2>, scalar_prefetch = 0 : i64, scratch_operands = 0 : i64, tpu.core_type = #tpu.core_type<tc>, window_params = [{transform_indices = @transform_0, window_bounds = array<i64: 8, 32>}, {transform_indices = @transform_1, window_bounds = array<i64: 1, 32, 96>}, {transform_indices = @transform_2, window_bounds = array<i64: 1, 1, 96>}, {transform_indices = @transform_3, window_bounds = array<i64: 1, 2, 16, 32>}, {transform_indices = @transform_4, window_bounds = array<i64: 1, 1, 32>}, {transform_indices = @transform_5, window_bounds = array<i64: 1, 1, 32>}, {transform_indices = @transform_6, window_bounds = array<i64: 1, 1, 32>}, {transform_indices = @transform_7, window_bounds = array<i64: 1, 32, 64>}, {transform_indices = @transform_8, window_bounds = array<i64: 1, 1, 64>}, {transform_indices = @transform_9, window_bounds = array<i64: 1, 64, 32>}, {transform_indices = @transform_10, window_bounds = array<i64: 1, 1, 32>}, {transform_indices = @transform_11, window_bounds = array<i64: 1, 1, 32>}, {transform_indices = @transform_12, window_bounds = array<i64: 1, 1, 32>}, {transform_indices = @transform_13, window_bounds = array<i64: 8, 32>}]} {
    %c0_i32 = arith.constant 0 : i32
    %0 = arith.cmpi eq, %arg1, %c0_i32 : i32
    %1 = arith.extui %0 : i1 to i32
    %c0_i32_0 = arith.constant 0 : i32
    %2 = arith.cmpi ne, %1, %c0_i32_0 : i32
    scf.if %2 {
      %c0_65 = arith.constant 0 : index
      %c0_66 = arith.constant 0 : index
      %152 = vector.load %arg2[%c0_65, %c0_66] : memref<8x32xf32, #tpu.memory_space<vmem>>, vector<8x32xf32>
      %c0_67 = arith.constant 0 : index
      %c0_68 = arith.constant 0 : index
      %153 = vector.load %arg15[%c0_67, %c0_68] : memref<8x32xf32, #tpu.memory_space<vmem>>, vector<8x32xf32>
      tpu.vector_store %arg15[%c0_67, %c0_68], %152 {strides = array<i32>} : memref<8x32xf32, #tpu.memory_space<vmem>>, vector<8x32xf32>,
    } else {
    }
    %c0 = arith.constant 0 : index
    %c0_1 = arith.constant 0 : index
    %3 = vector.load %arg15[%c0, %c0_1] : memref<8x32xf32, #tpu.memory_space<vmem>>, vector<8x32xf32>
    %4 = arith.truncf %3 : vector<8x32xf32> to vector<8x32xbf16>
    %c0_2 = arith.constant 0 : index
    %c0_3 = arith.constant 0 : index
    %c0_4 = arith.constant 0 : index
    %5 = vector.load %arg3[%c0_2, %c0_3, %c0_4] : memref<1x32x96xbf16, #tpu.memory_space<vmem>>, vector<1x32x96xbf16>
    %6 = vector.shape_cast %5 : vector<1x32x96xbf16> to vector<32x96xbf16>
    %cst = arith.constant dense<0.000000e+00> : vector<8x96xf32>
    %7 = tpu.matmul %4, %6, %cst {dimension_numbers = #tpu.dot_dimension_numbers<[1], [0], [0], [1], [0, 0, 1, 1], [], []>} : vector<8x32xbf16>, vector<32x96xbf16>, vector<8x96xf32> -> vector<8x96xf32>
    %c0_5 = arith.constant 0 : index
    %c0_6 = arith.constant 0 : index
    %c0_7 = arith.constant 0 : index
    %8 = vector.load %arg4[%c0_5, %c0_6, %c0_7] : memref<1x1x96xf32, #tpu.memory_space<vmem>>, vector<1x1x96xf32>
    %9 = vector.shape_cast %8 : vector<1x1x96xf32> to vector<1x96xf32>
    %10 = vector.broadcast %9 : vector<1x96xf32> to vector<8x96xf32>
    %11 = arith.addf %7, %10 : vector<8x96xf32>
    %c0_8 = arith.constant 0 : index
    %c0_9 = arith.constant 0 : index
    %c0_10 = arith.constant 0 : index
    %c0_11 = arith.constant 0 : index
    %12 = vector.load %arg5[%c0_8, %c0_9, %c0_10, %c0_11] : memref<1x2x16x32xbf16, #tpu.memory_space<vmem>>, vector<1x2x16x32xbf16>
    %13 = vector.shape_cast %12 : vector<1x2x16x32xbf16> to vector<2x16x32xbf16>
    %cst_12 = arith.constant 0.000000e+00 : f32
    %14 = vector.broadcast %cst_12 : f32 to vector<8x32xf32>
    %15 = vector.extract_strided_slice %11 {offsets = [0, 0], sizes = [8, 16], strides = [1, 1]} : vector<8x96xf32> to vector<8x16xf32>
    %16 = vector.extract_strided_slice %11 {offsets = [0, 32], sizes = [8, 16], strides = [1, 1]} : vector<8x96xf32> to vector<8x16xf32>
    %17 = vector.extract_strided_slice %11 {offsets = [0, 64], sizes = [8, 16], strides = [1, 1]} : vector<8x96xf32> to vector<8x16xf32>
    %18 = vector.shape_cast %15 : vector<8x16xf32> to vector<1x8x16xf32>
    %19 = arith.truncf %18 : vector<1x8x16xf32> to vector<1x8x16xbf16>
    %20 = vector.shape_cast %16 : vector<8x16xf32> to vector<1x8x16xf32>
    %21 = arith.truncf %20 : vector<1x8x16xf32> to vector<1x8x16xbf16>
    %22 = vector.shape_cast %17 : vector<8x16xf32> to vector<1x8x16xf32>
    %23 = arith.truncf %22 : vector<1x8x16xf32> to vector<1x8x16xbf16>
    "tpu.trace_start"() <{level = 10 : i32, message = "bqd,bkd->bqk"}> : () -> ()
    %cst_13 = arith.constant dense<0.000000e+00> : vector<1x8x8xf32>
    %24 = tpu.matmul %19, %21, %cst_13 {dimension_numbers = #tpu.dot_dimension_numbers<[2], [2], [1], [1], [0, 0, 0, 1, 1, 1], [0], [0]>} : vector<1x8x16xbf16>, vector<1x8x16xbf16>, vector<1x8x8xf32> -> vector<1x8x8xf32>
    "tpu.trace_stop"() : () -> ()
    %cst_14 = arith.constant dense<0xFF800000> : vector<1x8xf32>
    %25 = vector.multi_reduction <maximumf>, %24, %cst_14 [2] : vector<1x8x8xf32> to vector<1x8xf32>
    %26 = vector.shape_cast %25 : vector<1x8xf32> to vector<1x8x1xf32>
    %27 = vector.broadcast %26 : vector<1x8x1xf32> to vector<1x8x8xf32>
    %28 = arith.subf %24, %27 : vector<1x8x8xf32>
    %29 = math.exp %28 : vector<1x8x8xf32>
    %cst_15 = arith.constant dense<0.000000e+00> : vector<1x8xf32>
    %30 = vector.multi_reduction <add>, %29, %cst_15 [2] : vector<1x8x8xf32> to vector<1x8xf32>
    %31 = vector.shape_cast %30 : vector<1x8xf32> to vector<1x8x1xf32>
    %32 = tpu.reciprocal %31 {approx = true} : vector<1x8x1xf32> -> vector<1x8x1xf32>
    %33 = vector.broadcast %32 : vector<1x8x1xf32> to vector<1x8x8xf32>
    %34 = arith.mulf %29, %33 : vector<1x8x8xf32>
    %35 = arith.truncf %34 : vector<1x8x8xf32> to vector<1x8x8xbf16>
    "tpu.trace_start"() <{level = 10 : i32, message = "bqk,bkd->bqd"}> : () -> ()
    %cst_16 = arith.constant dense<0.000000e+00> : vector<1x8x16xf32>
    %36 = tpu.matmul %35, %23, %cst_16 {dimension_numbers = #tpu.dot_dimension_numbers<[2], [1], [1], [2], [0, 0, 0, 1, 1, 2], [0], [0]>} : vector<1x8x8xbf16>, vector<1x8x16xbf16>, vector<1x8x16xf32> -> vector<1x8x16xf32>
    "tpu.trace_stop"() : () -> ()
    %37 = vector.shape_cast %36 : vector<1x8x16xf32> to vector<8x16xf32>
    %38 = arith.truncf %37 : vector<8x16xf32> to vector<8x16xbf16>
    %39 = vector.extract_strided_slice %13 {offsets = [0, 0, 0], sizes = [1, 16, 32], strides = [1, 1, 1]} : vector<2x16x32xbf16> to vector<1x16x32xbf16>
    %40 = vector.shape_cast %39 : vector<1x16x32xbf16> to vector<16x32xbf16>
    %cst_17 = arith.constant dense<0.000000e+00> : vector<8x32xf32>
    %41 = tpu.matmul %38, %40, %cst_17 {dimension_numbers = #tpu.dot_dimension_numbers<[1], [0], [0], [1], [0, 0, 1, 1], [], []>} : vector<8x16xbf16>, vector<16x32xbf16>, vector<8x32xf32> -> vector<8x32xf32>
    %42 = arith.addf %14, %41 : vector<8x32xf32>
    %43 = vector.extract_strided_slice %11 {offsets = [0, 16], sizes = [8, 16], strides = [1, 1]} : vector<8x96xf32> to vector<8x16xf32>
    %44 = vector.extract_strided_slice %11 {offsets = [0, 48], sizes = [8, 16], strides = [1, 1]} : vector<8x96xf32> to vector<8x16xf32>
    %45 = vector.extract_strided_slice %11 {offsets = [0, 80], sizes = [8, 16], strides = [1, 1]} : vector<8x96xf32> to vector<8x16xf32>
    %46 = vector.shape_cast %43 : vector<8x16xf32> to vector<1x8x16xf32>
    %47 = arith.truncf %46 : vector<1x8x16xf32> to vector<1x8x16xbf16>
    %48 = vector.shape_cast %44 : vector<8x16xf32> to vector<1x8x16xf32>
    %49 = arith.truncf %48 : vector<1x8x16xf32> to vector<1x8x16xbf16>
    %50 = vector.shape_cast %45 : vector<8x16xf32> to vector<1x8x16xf32>
    %51 = arith.truncf %50 : vector<1x8x16xf32> to vector<1x8x16xbf16>
    "tpu.trace_start"() <{level = 10 : i32, message = "bqd,bkd->bqk"}> : () -> ()
    %cst_18 = arith.constant dense<0.000000e+00> : vector<1x8x8xf32>
    %52 = tpu.matmul %47, %49, %cst_18 {dimension_numbers = #tpu.dot_dimension_numbers<[2], [2], [1], [1], [0, 0, 0, 1, 1, 1], [0], [0]>} : vector<1x8x16xbf16>, vector<1x8x16xbf16>, vector<1x8x8xf32> -> vector<1x8x8xf32>
    "tpu.trace_stop"() : () -> ()
    %cst_19 = arith.constant dense<0xFF800000> : vector<1x8xf32>
    %53 = vector.multi_reduction <maximumf>, %52, %cst_19 [2] : vector<1x8x8xf32> to vector<1x8xf32>
    %54 = vector.shape_cast %53 : vector<1x8xf32> to vector<1x8x1xf32>
    %55 = vector.broadcast %54 : vector<1x8x1xf32> to vector<1x8x8xf32>
    %56 = arith.subf %52, %55 : vector<1x8x8xf32>
    %57 = math.exp %56 : vector<1x8x8xf32>
    %cst_20 = arith.constant dense<0.000000e+00> : vector<1x8xf32>
    %58 = vector.multi_reduction <add>, %57, %cst_20 [2] : vector<1x8x8xf32> to vector<1x8xf32>
    %59 = vector.shape_cast %58 : vector<1x8xf32> to vector<1x8x1xf32>
    %60 = tpu.reciprocal %59 {approx = true} : vector<1x8x1xf32> -> vector<1x8x1xf32>
    %61 = vector.broadcast %60 : vector<1x8x1xf32> to vector<1x8x8xf32>
    %62 = arith.mulf %57, %61 : vector<1x8x8xf32>
    %63 = arith.truncf %62 : vector<1x8x8xf32> to vector<1x8x8xbf16>
    "tpu.trace_start"() <{level = 10 : i32, message = "bqk,bkd->bqd"}> : () -> ()
    %cst_21 = arith.constant dense<0.000000e+00> : vector<1x8x16xf32>
    %64 = tpu.matmul %63, %51, %cst_21 {dimension_numbers = #tpu.dot_dimension_numbers<[2], [1], [1], [2], [0, 0, 0, 1, 1, 2], [0], [0]>} : vector<1x8x8xbf16>, vector<1x8x16xbf16>, vector<1x8x16xf32> -> vector<1x8x16xf32>
    "tpu.trace_stop"() : () -> ()
    %65 = vector.shape_cast %64 : vector<1x8x16xf32> to vector<8x16xf32>
    %66 = arith.truncf %65 : vector<8x16xf32> to vector<8x16xbf16>
    %67 = vector.extract_strided_slice %13 {offsets = [1, 0, 0], sizes = [1, 16, 32], strides = [1, 1, 1]} : vector<2x16x32xbf16> to vector<1x16x32xbf16>
    %68 = vector.shape_cast %67 : vector<1x16x32xbf16> to vector<16x32xbf16>
    %cst_22 = arith.constant dense<0.000000e+00> : vector<8x32xf32>
    %69 = tpu.matmul %66, %68, %cst_22 {dimension_numbers = #tpu.dot_dimension_numbers<[1], [0], [0], [1], [0, 0, 1, 1], [], []>} : vector<8x16xbf16>, vector<16x32xbf16>, vector<8x32xf32> -> vector<8x32xf32>
    %70 = arith.addf %42, %69 : vector<8x32xf32>
    %c0_23 = arith.constant 0 : index
    %c0_24 = arith.constant 0 : index
    %c0_25 = arith.constant 0 : index
    %71 = vector.load %arg6[%c0_23, %c0_24, %c0_25] : memref<1x1x32xf32, #tpu.memory_space<vmem>>, vector<1x1x32xf32>
    %72 = vector.shape_cast %71 : vector<1x1x32xf32> to vector<1x32xf32>
    %73 = vector.broadcast %72 : vector<1x32xf32> to vector<8x32xf32>
    %74 = arith.addf %70, %73 : vector<8x32xf32>
    %75 = arith.addf %74, %3 : vector<8x32xf32>
    %cst_26 = arith.constant dense<0.000000e+00> : vector<8xf32>
    %76 = vector.multi_reduction <add>, %75, %cst_26 [1] : vector<8x32xf32> to vector<8xf32>
    %77 = vector.shape_cast %76 : vector<8xf32> to vector<8x1xf32>
    %cst_27 = arith.constant 3.200000e+01 : f32
    %78 = vector.broadcast %cst_27 : f32 to vector<8x1xf32>
    %79 = arith.divf %77, %78 : vector<8x1xf32>
    %80 = vector.broadcast %79 : vector<8x1xf32> to vector<8x32xf32>
    %81 = arith.subf %75, %80 : vector<8x32xf32>
    %82 = vector.broadcast %79 : vector<8x1xf32> to vector<8x32xf32>
    %83 = arith.subf %75, %82 : vector<8x32xf32>
    %84 = arith.mulf %81, %83 : vector<8x32xf32>
    %cst_28 = arith.constant dense<0.000000e+00> : vector<8xf32>
    %85 = vector.multi_reduction <add>, %84, %cst_28 [1] : vector<8x32xf32> to vector<8xf32>
    %86 = vector.shape_cast %85 : vector<8xf32> to vector<8x1xf32>
    %cst_29 = arith.constant 3.200000e+01 : f32
    %87 = vector.broadcast %cst_29 : f32 to vector<8x1xf32>
    %88 = arith.divf %86, %87 : vector<8x1xf32>
    %89 = vector.broadcast %79 : vector<8x1xf32> to vector<8x32xf32>
    %90 = arith.subf %75, %89 : vector<8x32xf32>
    %cst_30 = arith.constant 9.99999997E-7 : f32
    %91 = vector.broadcast %cst_30 : f32 to vector<8x1xf32>
    %92 = arith.addf %88, %91 : vector<8x1xf32>
    %93 = math.rsqrt %92 : vector<8x1xf32>
    %94 = vector.broadcast %93 : vector<8x1xf32> to vector<8x32xf32>
    %95 = arith.mulf %90, %94 : vector<8x32xf32>
    %c0_31 = arith.constant 0 : index
    %c0_32 = arith.constant 0 : index
    %c0_33 = arith.constant 0 : index
    %96 = vector.load %arg7[%c0_31, %c0_32, %c0_33] : memref<1x1x32xf32, #tpu.memory_space<vmem>>, vector<1x1x32xf32>
    %97 = vector.shape_cast %96 : vector<1x1x32xf32> to vector<1x32xf32>
    %98 = vector.broadcast %97 : vector<1x32xf32> to vector<8x32xf32>
    %99 = arith.mulf %95, %98 : vector<8x32xf32>
    %c0_34 = arith.constant 0 : index
    %c0_35 = arith.constant 0 : index
    %c0_36 = arith.constant 0 : index
    %100 = vector.load %arg8[%c0_34, %c0_35, %c0_36] : memref<1x1x32xf32, #tpu.memory_space<vmem>>, vector<1x1x32xf32>
    %101 = vector.shape_cast %100 : vector<1x1x32xf32> to vector<1x32xf32>
    %102 = vector.broadcast %101 : vector<1x32xf32> to vector<8x32xf32>
    %103 = arith.addf %99, %102 : vector<8x32xf32>
    %104 = arith.truncf %103 : vector<8x32xf32> to vector<8x32xbf16>
    %c0_37 = arith.constant 0 : index
    %c0_38 = arith.constant 0 : index
    %c0_39 = arith.constant 0 : index
    %105 = vector.load %arg9[%c0_37, %c0_38, %c0_39] : memref<1x32x64xbf16, #tpu.memory_space<vmem>>, vector<1x32x64xbf16>
    %106 = vector.shape_cast %105 : vector<1x32x64xbf16> to vector<32x64xbf16>
    %cst_40 = arith.constant dense<0.000000e+00> : vector<8x64xf32>
    %107 = tpu.matmul %104, %106, %cst_40 {dimension_numbers = #tpu.dot_dimension_numbers<[1], [0], [0], [1], [0, 0, 1, 1], [], []>} : vector<8x32xbf16>, vector<32x64xbf16>, vector<8x64xf32> -> vector<8x64xf32>
    %c0_41 = arith.constant 0 : index
    %c0_42 = arith.constant 0 : index
    %c0_43 = arith.constant 0 : index
    %108 = vector.load %arg10[%c0_41, %c0_42, %c0_43] : memref<1x1x64xf32, #tpu.memory_space<vmem>>, vector<1x1x64xf32>
    %109 = vector.shape_cast %108 : vector<1x1x64xf32> to vector<1x64xf32>
    %110 = vector.broadcast %109 : vector<1x64xf32> to vector<8x64xf32>
    %111 = arith.addf %107, %110 : vector<8x64xf32>
    %cst_44 = arith.constant 0.000000e+00 : f32
    %112 = vector.broadcast %cst_44 : f32 to vector<8x64xf32>
    %113 = arith.maximumf %111, %112 : vector<8x64xf32>
    %114 = arith.truncf %113 : vector<8x64xf32> to vector<8x64xbf16>
    %c0_45 = arith.constant 0 : index
    %c0_46 = arith.constant 0 : index
    %c0_47 = arith.constant 0 : index
    %115 = vector.load %arg11[%c0_45, %c0_46, %c0_47] : memref<1x64x32xbf16, #tpu.memory_space<vmem>>, vector<1x64x32xbf16>
    %116 = vector.shape_cast %115 : vector<1x64x32xbf16> to vector<64x32xbf16>
    %cst_48 = arith.constant dense<0.000000e+00> : vector<8x32xf32>
    %117 = tpu.matmul %114, %116, %cst_48 {dimension_numbers = #tpu.dot_dimension_numbers<[1], [0], [0], [1], [0, 0, 1, 1], [], []>} : vector<8x64xbf16>, vector<64x32xbf16>, vector<8x32xf32> -> vector<8x32xf32>
    %c0_49 = arith.constant 0 : index
    %c0_50 = arith.constant 0 : index
    %c0_51 = arith.constant 0 : index
    %118 = vector.load %arg12[%c0_49, %c0_50, %c0_51] : memref<1x1x32xf32, #tpu.memory_space<vmem>>, vector<1x1x32xf32>
    %119 = vector.shape_cast %118 : vector<1x1x32xf32> to vector<1x32xf32>
    %120 = vector.broadcast %119 : vector<1x32xf32> to vector<8x32xf32>
    %121 = arith.addf %117, %120 : vector<8x32xf32>
    %122 = arith.addf %121, %103 : vector<8x32xf32>
    %cst_52 = arith.constant dense<0.000000e+00> : vector<8xf32>
    %123 = vector.multi_reduction <add>, %122, %cst_52 [1] : vector<8x32xf32> to vector<8xf32>
    %124 = vector.shape_cast %123 : vector<8xf32> to vector<8x1xf32>
    %cst_53 = arith.constant 3.200000e+01 : f32
    %125 = vector.broadcast %cst_53 : f32 to vector<8x1xf32>
    %126 = arith.divf %124, %125 : vector<8x1xf32>
    %127 = vector.broadcast %126 : vector<8x1xf32> to vector<8x32xf32>
    %128 = arith.subf %122, %127 : vector<8x32xf32>
    %129 = vector.broadcast %126 : vector<8x1xf32> to vector<8x32xf32>
    %130 = arith.subf %122, %129 : vector<8x32xf32>
    %131 = arith.mulf %128, %130 : vector<8x32xf32>
    %cst_54 = arith.constant dense<0.000000e+00> : vector<8xf32>
    %132 = vector.multi_reduction <add>, %131, %cst_54 [1] : vector<8x32xf32> to vector<8xf32>
    %133 = vector.shape_cast %132 : vector<8xf32> to vector<8x1xf32>
    %cst_55 = arith.constant 3.200000e+01 : f32
    %134 = vector.broadcast %cst_55 : f32 to vector<8x1xf32>
    %135 = arith.divf %133, %134 : vector<8x1xf32>
    %136 = vector.broadcast %126 : vector<8x1xf32> to vector<8x32xf32>
    %137 = arith.subf %122, %136 : vector<8x32xf32>
    %cst_56 = arith.constant 9.99999997E-7 : f32
    %138 = vector.broadcast %cst_56 : f32 to vector<8x1xf32>
    %139 = arith.addf %135, %138 : vector<8x1xf32>
    %140 = math.rsqrt %139 : vector<8x1xf32>
    %141 = vector.broadcast %140 : vector<8x1xf32> to vector<8x32xf32>
    %142 = arith.mulf %137, %141 : vector<8x32xf32>
    %c0_57 = arith.constant 0 : index
    %c0_58 = arith.constant 0 : index
    %c0_59 = arith.constant 0 : index
    %143 = vector.load %arg13[%c0_57, %c0_58, %c0_59] : memref<1x1x32xf32, #tpu.memory_space<vmem>>, vector<1x1x32xf32>
    %144 = vector.shape_cast %143 : vector<1x1x32xf32> to vector<1x32xf32>
    %145 = vector.broadcast %144 : vector<1x32xf32> to vector<8x32xf32>
    %146 = arith.mulf %142, %145 : vector<8x32xf32>
    %c0_60 = arith.constant 0 : index
    %c0_61 = arith.constant 0 : index
    %c0_62 = arith.constant 0 : index
    %147 = vector.load %arg14[%c0_60, %c0_61, %c0_62] : memref<1x1x32xf32, #tpu.memory_space<vmem>>, vector<1x1x32xf32>
    %148 = vector.shape_cast %147 : vector<1x1x32xf32> to vector<1x32xf32>
    %149 = vector.broadcast %148 : vector<1x32xf32> to vector<8x32xf32>
    %150 = arith.addf %146, %149 : vector<8x32xf32>
    %c0_63 = arith.constant 0 : index
    %c0_64 = arith.constant 0 : index
    %151 = vector.load %arg15[%c0_63, %c0_64] : memref<8x32xf32, #tpu.memory_space<vmem>>, vector<8x32xf32>
    tpu.vector_store %arg15[%c0_63, %c0_64], %150 {strides = array<i32>} : memref<8x32xf32, #tpu.memory_space<vmem>>, vector<8x32xf32>,
    return
  }
  func.func @transform_0(%arg0: i32, %arg1: i32) -> (i32, i32) {
    %c0_i32 = arith.constant 0 : i32
    %c0_i32_0 = arith.constant 0 : i32
    return %arg0, %c0_i32 : i32, i32
  }
  func.func @transform_1(%arg0: i32, %arg1: i32) -> (i32, i32, i32) {
    %c0_i32 = arith.constant 0 : i32
    %c0_i32_0 = arith.constant 0 : i32
    %c0_i32_1 = arith.constant 0 : i32
    return %arg1, %c0_i32, %c0_i32_0 : i32, i32, i32
  }
  func.func @transform_2(%arg0: i32, %arg1: i32) -> (i32, i32, i32) {
    %c0_i32 = arith.constant 0 : i32
    %c0_i32_0 = arith.constant 0 : i32
    %c0_i32_1 = arith.constant 0 : i32
    return %arg1, %c0_i32, %c0_i32_0 : i32, i32, i32
  }
  func.func @transform_3(%arg0: i32, %arg1: i32) -> (i32, i32, i32, i32) {
    %c0_i32 = arith.constant 0 : i32
    %c0_i32_0 = arith.constant 0 : i32
    %c0_i32_1 = arith.constant 0 : i32
    %c0_i32_2 = arith.constant 0 : i32
    return %arg1, %c0_i32, %c0_i32_0, %c0_i32_1 : i32, i32, i32, i32
  }
  func.func @transform_4(%arg0: i32, %arg1: i32) -> (i32, i32, i32) {
    %c0_i32 = arith.constant 0 : i32
    %c0_i32_0 = arith.constant 0 : i32
    %c0_i32_1 = arith.constant 0 : i32
    return %arg1, %c0_i32, %c0_i32_0 : i32, i32, i32
  }
  func.func @transform_5(%arg0: i32, %arg1: i32) -> (i32, i32, i32) {
    %c0_i32 = arith.constant 0 : i32
    %c0_i32_0 = arith.constant 0 : i32
    %c0_i32_1 = arith.constant 0 : i32
    return %arg1, %c0_i32, %c0_i32_0 : i32, i32, i32
  }
  func.func @transform_6(%arg0: i32, %arg1: i32) -> (i32, i32, i32) {
    %c0_i32 = arith.constant 0 : i32
    %c0_i32_0 = arith.constant 0 : i32
    %c0_i32_1 = arith.constant 0 : i32
    return %arg1, %c0_i32, %c0_i32_0 : i32, i32, i32
  }
  func.func @transform_7(%arg0: i32, %arg1: i32) -> (i32, i32, i32) {
    %c0_i32 = arith.constant 0 : i32
    %c0_i32_0 = arith.constant 0 : i32
    %c0_i32_1 = arith.constant 0 : i32
    return %arg1, %c0_i32, %c0_i32_0 : i32, i32, i32
  }
  func.func @transform_8(%arg0: i32, %arg1: i32) -> (i32, i32, i32) {
    %c0_i32 = arith.constant 0 : i32
    %c0_i32_0 = arith.constant 0 : i32
    %c0_i32_1 = arith.constant 0 : i32
    return %arg1, %c0_i32, %c0_i32_0 : i32, i32, i32
  }
  func.func @transform_9(%arg0: i32, %arg1: i32) -> (i32, i32, i32) {
    %c0_i32 = arith.constant 0 : i32
    %c0_i32_0 = arith.constant 0 : i32
    %c0_i32_1 = arith.constant 0 : i32
    return %arg1, %c0_i32, %c0_i32_0 : i32, i32, i32
  }
  func.func @transform_10(%arg0: i32, %arg1: i32) -> (i32, i32, i32) {
    %c0_i32 = arith.constant 0 : i32
    %c0_i32_0 = arith.constant 0 : i32
    %c0_i32_1 = arith.constant 0 : i32
    return %arg1, %c0_i32, %c0_i32_0 : i32, i32, i32
  }
  func.func @transform_11(%arg0: i32, %arg1: i32) -> (i32, i32, i32) {
    %c0_i32 = arith.constant 0 : i32
    %c0_i32_0 = arith.constant 0 : i32
    %c0_i32_1 = arith.constant 0 : i32
    return %arg1, %c0_i32, %c0_i32_0 : i32, i32, i32
  }
  func.func @transform_12(%arg0: i32, %arg1: i32) -> (i32, i32, i32) {
    %c0_i32 = arith.constant 0 : i32
    %c0_i32_0 = arith.constant 0 : i32
    %c0_i32_1 = arith.constant 0 : i32
    return %arg1, %c0_i32, %c0_i32_0 : i32, i32, i32
  }
  func.func @transform_13(%arg0: i32, %arg1: i32) -> (i32, i32) {
    %c0_i32 = arith.constant 0 : i32
    %c0_i32_0 = arith.constant 0 : i32
    return %arg0, %c0_i32 : i32, i32
  }
}

</mosaic_0001>

<bundles_post_ra>
// kernel: tpu_custom_call.1
= control target key start
LH: loop header
LB: loop body
LE: loop exit
PB: predicated region body
PF: predicated region fallthrough
CT: control target
= control target key end

     0   :  { %s2822_s0 = inlined_call_operand.hbm [shape: f32[16,32], index: 0, kind: input, shape index: {}]   ;;  %s2823_s1 = inlined_call_operand.vmem [shape: bf16[2,32,96], index: 1, kind: input, shape index: {}]   ;;  %s2824_s2 = inlined_call_operand.vmem [shape: f32[2,1,96], index: 2, kind: input, shape index: {}]   ;;  %s2825_s3 = inlined_call_operand.vmem [shape: bf16[2,2,16,32], index: 3, kind: input, shape index: {}]   ;;  %s2826_s4 = inlined_call_operand.hbm [shape: f32[2,1,32], index: 4, kind: input, shape index: {}]   ;;  %s2827_s5 = inlined_call_operand.hbm [shape: f32[2,1,32], index: 5, kind: input, shape index: {}]   ;;  %s2828_s6 = inlined_call_operand.hbm [shape: f32[2,1,32], index: 6, kind: input, shape index: {}]   ;;  %s2829_s7 = inlined_call_operand.vmem [shape: bf16[2,32,64], index: 7, kind: input, shape index: {}]   ;;  %s2830_s8 = inlined_call_operand.hbm [shape: f32[2,1,64], index: 8, kind: input, shape index: {}]   ;;  %s2831_s9 = inlined_call_operand.vmem [shape: bf16[2,64,32], index: 9, kind: input, shape index: {}]   ;;  %s2832_s10 = inlined_call_operand.vmem [shape: f32[2,1,32], index: 10, kind: input, shape index: {}]   ;;  %s2833_s11 = inlined_call_operand.vmem [shape: f32[2,1,32], index: 11, kind: input, shape index: {}]   ;;  %s2834_s12 = inlined_call_operand.vmem [shape: f32[2,1,32], index: 12, kind: input, shape index: {}]   ;;  %s2835_s13 = inlined_call_operand.hbm [shape: f32[16,32], index: 13, kind: output, shape index: {}]  }
   0x1   :  { %2859 = sst [smem:[#allocation31_spill]] %s2822_s0 }
   0x2   :  { %2860 = sst [smem:[#allocation32_spill]] %s2823_s1 }
   0x3   :  { %2861 = sst [smem:[#allocation33_spill]] %s2824_s2 }
   0x4   :  { %2862 = sst [smem:[#allocation34_spill]] %s2825_s3 }
   0x5   :  { %2863 = sst [smem:[#allocation35_spill]] %s2826_s4 }
   0x6   :  { %2864 = sst [smem:[#allocation36_spill]] %s2827_s5 }
   0x7   :  { %2865 = sst [smem:[#allocation37_spill]] %s2828_s6 }
   0x8   :  { %2866 = sst [smem:[#allocation38_spill]] %s2829_s7 }
   0x9   :  { %2867 = sst [smem:[#allocation39_spill]] %s2830_s8 }
   0xa   :  { %2868 = sst [smem:[#allocation40_spill]] %s2831_s9 }
   0xb   :  { %2869 = sst [smem:[#allocation41_spill]] %s2832_s10 }
   0xc   :  { %2870 = sst [smem:[#allocation42_spill]] %s2833_s11 }
   0xd   :  { %2871 = sst [smem:[#allocation43_spill]] %s2834_s12 }
   0xe   :  { %2872 = sst [smem:[#allocation44_spill]] %s2835_s13 }
   0xf   :  { %18 = vsyncpa [#allocation3], 0 }
  0x10   :  { %20 = vsyncpa [#allocation3 + $0x1], 0 }
  0x11   :  { %21 = vsyncpa [#allocation6], 0 }
  0x12   :  { %23 = vsyncpa [#allocation6 + $0x1], 0 }
  0x13   :  { %24 = vsyncpa [#allocation9], 0 }
  0x14   :  { %26 = vsyncpa [#allocation9 + $0x1], 0 }
  0x15   :  { %27 = vsyncpa [#allocation4], 0 }
  0x16   :  { %29 = vsyncpa [#allocation4 + $0x1], 0  ;;  %s2273_s25 = smov 0   ;;  %s2275_s26 = smov 0  }
  0x17   :  { %s2277_s27 = smov 0   ;;  %s2279_s28 = smov 0  }
  0x18   :  { %s2281_s29 = smov 0   ;;  %s2283_s30 = smov 0  }
  0x19   :  { %s2285_s14 = smov 0   ;;  %s2287_s15 = smov 0  }
  0x1a   :  { %s2289_s16 = smov 0   ;;  %s2291_s17 = smov 0  }
  0x1b   :  { %s2293_s18 = smov 0  }
  0x1c LB: > { %2873 = sst [smem:[#allocation16_spill]] %s2152_s26  ;;  %s44_s19 = sadd.s32 1, %s2180_s16  ;;  %s2188_s18 = sphi %s2293_s18, %s35_s18   ;;  %s2184_s17 = sphi %s2291_s17, %s2950_s17   ;;  %s2180_s16 = sphi %s2289_s16, %s2949_s16   ;;  %s2176_s15 = sphi %s2287_s15, %s2948_s15   ;;  %s2172_s14 = sphi %s2285_s14, %s2947_s14   ;;  %s2168_s30 = sphi %s2283_s30, %s2946_s30   ;;  %s2164_s29 = sphi %s2281_s29, %s2945_s29   ;;  %s2160_s28 = sphi %s2279_s28, %s2944_s28   ;;  %s2156_s27 = sphi %s2277_s27, %s2943_s27   ;;  %s2152_s26 = sphi %s2275_s26, %s2942_s26   ;;  %s2148_s25 = sphi %s2273_s25, %s2941_s25  }
  0x1d   : > { %2874 = sst [smem:[#allocation17_spill]] %s2156_s27  ;;  %p2841_p0 = scmp.eq.s32.totalorder %s2188_s18, 0 }
  0x1e   : > { %2875 = sst [smem:[#allocation18_spill]] %s2160_s28  ;;  %p2330_p1 = scmp.ge.s32.totalorder %s44_s19, 2 }
  0x1f   : > { %2876 = sst [smem:[#allocation19_spill]] %s2164_s29  ;;  %s158_s21 = sadd.s32 1, %s2156_s27 }
  0x20   : > { %2877 = sst [smem:[#allocation20_spill]] %s2168_s30  ;;  %p165_p2 = scmp.ne.s32.totalorder %s2156_s27, %s2152_s26 }
  0x21   : > { %2878 = sst [smem:[#allocation21_spill]] %s2172_s14  ;;  %s2952_s19 = smov (%p2330_p1, %s44_s19), 0 }
  0x22   : > { %2879 = sst [smem:[#allocation22_spill]] %s2176_s15  ;;  %p167_p4 = por %p165_p2, %p2841_p0 }
  0x23   : > { %2880 = sst [smem:[#allocation23_spill]] %s2180_s16  ;;  %s155_s22 = ssub.s32 %s2180_s16, %s2952_s19 }
  0x24   : > { %2881 = sst [smem:[#allocation24_spill]] %s2184_s17  ;;  %p2840_p5 = scmp.lt.s32.totalorder %s2188_s18, 4 }
  0x25   : > { %s2882_s20 = scalar_select %p2330_p1, 1, 0 }
  0x26   : > { %2883 = sst [smem:[#allocation25_spill]] %s2952_s19  ;;  %p156_p6 = scmp.eq.s32.totalorder %s155_s22, 0 }
  0x27   : > { %s2842_s23 = sand.u32 1, %s2188_s18   ;;  %s2350_s24 = sand.u32 1, %s2156_s27  }
  0x28   : > { %s2353_s13 = scalar_select %p156_p6, %s2156_s27, %s158_s21  }
  0x29   : > { %s2356_s15 = sshll.u32 %s2180_s16, 4  ;;  %s2885_s4 = sld [smem:[#allocation35_spill]] }
  0x2a   : > { %2884 = sst [smem:[#allocation26_spill]] %s2353_s13  ;;  %s472_s19 = scalar_lea.vmem [#allocation5], %s2350_s24 }
  0x2b   : > { %s479_s22 = sshll.u32 %s472_s19, 4  ;;  %p2369_p7 = pnand %p2840_p5, %p167_p4  ;;  %s2365_s22 = int_to_ptr.vmem [resolvable:$true] %s479_s22 }
  0x2c   : > { %s2377_s11 = scalar_lea.sflag [#allocation6], %s2842_s23 }
  0x2d   : > { %s2886_s21 = scalar_select %p2369_p7, 1, 0 }
  0x2e   : > { %p2383_p11 = pneg %p2369_p7 }
  0x2f   : > { %s2362_s10 = scalar_lea.hbm %s2885_s4, %s2356_s15  ;;  %s1913_s27 = scalar_lea.hbm %s2885_s4, 32 }
  0x30   : > { %s1908_s12 = scalar_lea.hbm %s2362_s10, 16  ;;  %p1914_p2 = scmp.lt.u32.totalorder %s2362_s10, %s2885_s4 }
  0x31   : > { %p1909_p10 = scmp.ne.s32.totalorder %s2362_s10, %s1908_s12  ;;  %p1915_p4 = scmp.lt.u32.totalorder %s1913_s27, %s1908_s12 }
  0x32   : > { %p1917_p5 = scmp.lt.u32.totalorder %s1908_s12, %s2362_s10 }
  0x33   : > { %p1911_p12 = pnand %p2383_p11, %p1909_p10  ;;  %p1916_p6 = por %p1915_p4, %p1914_p2 }
  0x35   : > { %p1912_p13 = pneg %p1911_p12  ;;  %p1918_p3 = por %p1917_p5, %p1916_p6 }
  0x37   : > { %p1919_p0 = pnand %p1918_p3, %p1912_p13 }
  0x39   : > { %1922 = shalt.err (!%p1919_p0)
}
  0x3a   : > { %s1923_s23 = scalar_lea.vmem %s2365_s22, 16  ;;  %s2190_s13 = smov [#allocation5]  }
  0x3b   : > { %p1924_p10 = scmp.ne.s32.totalorder %s2365_s22, %s1923_s23  ;;  %s1928_s19 = sshll.u32 %s2190_s13, 4  ;;  %s1929_s19 = int_to_ptr.vmem [resolvable:$false] %s1928_s19 }
  0x3c   : > { %s1930_s7 = scalar_lea.vmem %s1929_s19, 32  ;;  %p1931_p9 = scmp.lt.s32.totalorder %s2365_s22, %s1929_s19 }
  0x3d   : > { %p1926_p12 = pnand %p1924_p10, %p2383_p11  ;;  %p1932_p1 = scmp.lt.s32.totalorder %s1930_s7, %s1923_s23 }
  0x3f   : > { %p1927_p8 = pneg %p1926_p12  ;;  %p1933_p2 = por %p1932_p1, %p1931_p9 }
  0x41   : > { %p1934_p4 = pnand %p1933_p2, %p1927_p8 }
  0x43   : > { %1937 = shalt.err (!%p1934_p4)
}
  0x44   : > { %1775 = dma.hbm_to_vmem [thread:$0]  (!%p2369_p7), %s2362_s10, 16, %s2365_s22, %s2377_s11  }
  0x45   : > { %p2888_p0 = scmp.lt.s32.totalorder %s2188_s18, 5  ;;  %p2889_p3 = scmp.ge.s32.totalorder %s2188_s18, 1 }
  0x46   : > { %s2891_s6 = sld [smem:[#allocation37_spill]]  ;;  %s506_s13 = scalar_lea.vmem [#allocation8], %s2350_s24 }
  0x47   : > { %p2411_p5 = pnand %p2889_p3, %p2888_p0  ;;  %s513_s19 = sshll.u32 %s506_s13, 4  ;;  %s514_s19 = int_to_ptr.vmem [resolvable:$true] %s513_s19 }
  0x48   : > { %s2892_s7 = sand.u32 1, %s2188_s18  }
  0x49   : > { %s2890_s9 = scalar_select %p2411_p5, 1, 0 }
  0x4a   : > { %s2424_s10 = scalar_lea.sflag [#allocation9], %s2892_s7 }
  0x4c   : > { %s2419_s12 = scalar_lea.hbm %s2891_s6, %s2356_s15  ;;  %s1943_s27 = scalar_lea.hbm %s2891_s6, 32 }
  0x4d   : > { %s1938_s22 = scalar_lea.hbm %s2419_s12, 16  ;;  %p1944_p13 = scmp.lt.u32.totalorder %s2419_s12, %s2891_s6 }
  0x4e   : > { %p1939_p1 = scmp.ne.s32.totalorder %s2419_s12, %s1938_s22  ;;  %p1945_p6 = scmp.lt.u32.totalorder %s1943_s27, %s1938_s22 }
  0x4f   : > { %p1947_p12 = scmp.lt.u32.totalorder %s1938_s22, %s2419_s12 }
  0x50   : > { %p1941_p8 = pnand %p1939_p1, %p2383_p11  ;;  %p1946_p10 = por %p1945_p6, %p1944_p13 }
  0x52   : > { %p1942_p9 = pneg %p1941_p8  ;;  %p1948_p2 = por %p1947_p12, %p1946_p10 }
  0x54   : > { %p1949_p4 = pnand %p1948_p2, %p1942_p9 }
  0x56   : > { %1952 = shalt.err (!%p1949_p4)
}
  0x57   : > { %s1953_s13 = scalar_lea.vmem %s514_s19, 16  ;;  %s2191_s7 = smov [#allocation8]  }
  0x58   : > { %p1954_p0 = scmp.ne.s32.totalorder %s514_s19, %s1953_s13  ;;  %s1958_s2 = sshll.u32 %s2191_s7, 4  ;;  %s1959_s2 = int_to_ptr.vmem [resolvable:$false] %s1958_s2 }
  0x59   : > { %s1960_s3 = scalar_lea.vmem %s1959_s2, 32  ;;  %p1961_p8 = scmp.lt.s32.totalorder %s514_s19, %s1959_s2 }
  0x5a   : > { %p1956_p3 = pnand %p1954_p0, %p2383_p11  ;;  %p1962_p5 = scmp.lt.s32.totalorder %s1960_s3, %s1953_s13 }
  0x5c   : > { %p1957_p1 = pneg %p1956_p3  ;;  %p1963_p7 = por %p1962_p5, %p1961_p8 }
  0x5e   : > { %p1964_p6 = pnand %p1963_p7, %p1957_p1 }
  0x60   : > { %1967 = shalt.err (!%p1964_p6)
}
  0x61   : > { %p2893_p13 = scmp.ne.s32.totalorder %s2886_s21, 0  ;;  %s2445_s1 = sadd.s32 4294967295, %s2188_s18  }
  0x62   : > { %s1614_s2 = sadd.s32 4294967294, %s2188_s18   ;;  %s47_s4 = sadd.s32 1, %s2184_s17 }
  0x63   : > { %1781 = dma.hbm_to_vmem [thread:$0]  (!%p2893_p13), %s2419_s12, 16, %s514_s19, %s2424_s10  }
  0x64   : > { %p2894_p7 = scmp.ne.s32.totalorder %s2882_s20, 0  ;;  %s54_s22 = sadd.s32 1, %s2168_s30 }
  0x65   : > { %p61_p5 = scmp.ne.s32.totalorder %s2168_s30, %s2164_s29  ;;  %p67_p10 = scmp.ne.s32.totalorder %s2164_s29, %s2160_s28 }
  0x66   : > { %s2954_s4 = smov (!%p2894_p7, %s47_s4), %s2184_s17  ;;  %p2895_p12 = scmp.eq.s32.totalorder %s2188_s18, 0 }
  0x67   : > { %p49_p9 = scmp.ge.s32.totalorder %s2954_s4, 2  ;;  %p68_p4 = scmp.eq.s32.totalorder %s2445_s1, 0 }
  0x68   : > { %p2459_p2 = por %p2895_p12, %p61_p5  ;;  %p2899_p3 = scmp.ne.s32.totalorder %s2152_s26, %s2148_s25 }
  0x69   : > { %s2956_s4 = smov (%p49_p9, %s2954_s4), 0  ;;  %p2469_p0 = por %p68_p4, %p67_p10 }
  0x6a   : > { %2897 = sst [smem:[#allocation27_spill]] %s2956_s4  ;;  %p2476_p1 = por %p2899_p3, %p68_p4 }
  0x6b   : > { %s2898_s20 = scalar_select %p2469_p0, 1, 0 }
  0x6c   : > { %s2900_s19 = scalar_select %p2476_p1, 1, 0 }
  0x6d   : > { %s51_s27 = ssub.s32 %s2184_s17, %s2956_s4  ;;  %p403_p8 = scmp.eq.s32.totalorder %s2445_s1, 3 }
  0x6e   : > { %2901 = sst [smem:[#allocation28_spill]] %s2900_s19  ;;  %p52_p6 = scmp.eq.s32.totalorder %s51_s27, 0 }
  0x6f   : > { %p409_p7 = scmp.eq.s32.totalorder %s1614_s2, 3  ;;  %p2483_p9 = por %p403_p8, %p61_p5 }
  0x70   : > { %s429_s13 = sand.u32 1, %s2168_s30   ;;  %s1618_s6 = sshll.u32 %s2184_s17, 7 }
  0x71   : > { %s2902_s23 = scalar_select %p2483_p9, 1, 0 }
  0x72   : > { %s2489_s7 = scalar_select %p52_p6, %s2168_s30, %s54_s22  }
  0x73   : > { %p2494_p12 = por %p409_p7, %p67_p10  ;;  %s1617_s25 = sshll.u32 %s429_s13, 3 }
  0x74   : > { %2903 = sst [smem:[#allocation29_spill]] %s2489_s7  ;;  %s2906_s0 = sld [smem:[#allocation31_spill]] }
  0x75   : > { %s2904_s3 = scalar_select %p2494_p12, 1, 0 }
  0x76   : > { %s433_s2 = scalar_lea.vmem [#allocation2], %s1617_s25  ;;  %p2907_p5 = scmp.lt.s32.totalorder %s2188_s18, 4 }
  0x77   : > { %2905 = sst [smem:[#allocation30_spill]] %s2904_s3  ;;  %s440_s27 = sshll.u32 %s433_s2, 4  ;;  %s2512_s27 = int_to_ptr.vmem [resolvable:$true] %s440_s27 }
  0x78   : > { %p2508_p4 = pnand %p2907_p5, %p2459_p2  ;;  %s2909_s5 = sld [smem:[#allocation36_spill]] }
  0x79   : > { %s430_s19 = scalar_lea.sflag [#allocation3], %s429_s13 }
  0x7a   : > { %s2502_s4 = scalar_lea.hbm %s2906_s0, %s1618_s6  ;;  %p1970_p3 = pneg %p2508_p4 }
  0x7b   : > { %s1968_s7 = scalar_lea.hbm %s2502_s4, 128  ;;  %s1973_s2 = scalar_lea.hbm %s2906_s0, 256 }
  0x7c   : > { %p1969_p10 = scmp.ne.s32.totalorder %s2502_s4, %s1968_s7  ;;  %p1974_p6 = scmp.lt.u32.totalorder %s2502_s4, %s2906_s0 }
  0x7d   : > { %p1975_p7 = scmp.lt.u32.totalorder %s1973_s2, %s1968_s7  ;;  %p1977_p12 = scmp.lt.u32.totalorder %s1968_s7, %s2502_s4 }
  0x7e   : > { %s2518_s6 = scalar_lea.hbm %s2909_s5, %s2356_s15  ;;  %p1971_p2 = pnand %p1970_p3, %p1969_p10 }
  0x7f   : > { %p1976_p5 = por %p1975_p7, %p1974_p6 }
  0x80   : > { %p1972_p8 = pneg %p1971_p2 }
  0x81   : > { %p1978_p9 = por %p1977_p12, %p1976_p5 }
  0x83   : > { %p1979_p1 = pnand %p1978_p9, %p1972_p8 }
  0x85   : > { %1982 = shalt.err (!%p1979_p1)
}
  0x86   : > { %s1983_s17 = scalar_lea.vmem %s2512_s27, 128  ;;  %s2192_s13 = smov [#allocation2]  }
  0x87   : > { %p1984_p10 = scmp.ne.s32.totalorder %s2512_s27, %s1983_s17  ;;  %s1988_s14 = sshll.u32 %s2192_s13, 4  ;;  %s1989_s14 = int_to_ptr.vmem [resolvable:$false] %s1988_s14 }
  0x88   : > { %s1990_s30 = scalar_lea.vmem %s1989_s14, 256  ;;  %p1991_p13 = scmp.lt.s32.totalorder %s2512_s27, %s1989_s14 }
  0x89   : > { %p1986_p2 = pnand %p1984_p10, %p1970_p3  ;;  %p1992_p6 = scmp.lt.s32.totalorder %s1990_s30, %s1983_s17 }
  0x8b   : > { %p1987_p0 = pneg %p1986_p2  ;;  %p1993_p7 = por %p1992_p6, %p1991_p13 }
  0x8d   : > { %p1994_p12 = pnand %p1993_p7, %p1987_p0 }
  0x8f   : > { %1997 = shalt.err (!%p1994_p12)
}
  0x90   : > { %1772 = dma.hbm_to_vmem [thread:$0]  (!%p2508_p4), %s2502_s4, 128, %s2512_s27, %s430_s19  }
  0x91   : > { %s489_s7 = scalar_lea.vmem [#allocation7], %s2350_s24  ;;  %s2910_s8 = sld [smem:[#allocation39_spill]] }
  0x92   : > { %s496_s3 = sshll.u32 %s489_s7, 4  ;;  %s1998_s17 = scalar_lea.hbm %s2518_s6, 16  ;;  %s497_s3 = int_to_ptr.vmem [resolvable:$true] %s496_s3 }
  0x93   : > { %p1999_p13 = scmp.ne.s32.totalorder %s2518_s6, %s1998_s17  ;;  %s2003_s14 = scalar_lea.hbm %s2909_s5, 32 }
  0x94   : > { %p2004_p9 = scmp.lt.u32.totalorder %s2518_s6, %s2909_s5  ;;  %p2005_p4 = scmp.lt.u32.totalorder %s2003_s14, %s1998_s17 }
  0x95   : > { %p2001_p0 = pnand %p1999_p13, %p2383_p11  ;;  %p2007_p8 = scmp.lt.u32.totalorder %s1998_s17, %s2518_s6 }
  0x96   : > { %p2006_p3 = por %p2005_p4, %p2004_p9 }
  0x97   : > { %s2550_s2 = scalar_lea.hbm %s2910_s8, %s2356_s15  ;;  %p2002_p1 = pneg %p2001_p0 }
  0x98   : > { %p2008_p5 = por %p2007_p8, %p2006_p3 }
  0x9a   : > { %p2009_p10 = pnand %p2008_p5, %p2002_p1 }
  0x9c   : > { %2012 = shalt.err (!%p2009_p10)
}
  0x9d   : > { %s2013_s15 = scalar_lea.vmem %s497_s3, 16  ;;  %s2193_s4 = smov [#allocation7]  }
  0x9e   : > { %p2014_p2 = scmp.ne.s32.totalorder %s497_s3, %s2013_s15  ;;  %s2018_s27 = sshll.u32 %s2193_s4, 4  ;;  %s2019_s27 = int_to_ptr.vmem [resolvable:$false] %s2018_s27 }
  0x9f   : > { %s2020_s19 = scalar_lea.vmem %s2019_s27, 32  ;;  %p2021_p12 = scmp.lt.s32.totalorder %s497_s3, %s2019_s27 }
  0xa0   : > { %p2016_p6 = pnand %p2014_p2, %p2383_p11  ;;  %p2022_p13 = scmp.lt.s32.totalorder %s2020_s19, %s2013_s15 }
  0xa2   : > { %p2017_p7 = pneg %p2016_p6  ;;  %p2023_p0 = por %p2022_p13, %p2021_p12 }
  0xa4   : > { %p2024_p4 = pnand %p2023_p0, %p2017_p7 }
  0xa6   : > { %2027 = shalt.err (!%p2024_p4)
}
  0xa7   : > { %p2911_p9 = scmp.ne.s32.totalorder %s2886_s21, 0  ;;  %s531_s0 = scalar_lea.vmem [#allocation10], %s2350_s24 }
  0xa8   : > { %s538_s7 = sshll.u32 %s531_s0, 4  ;;  %s2028_s12 = scalar_lea.hbm %s2550_s2, 16  ;;  %s539_s7 = int_to_ptr.vmem [resolvable:$true] %s538_s7 }
  0xa9   : > { %1778 = dma.hbm_to_vmem [thread:$0]  (!%p2911_p9), %s2518_s6, 16, %s497_s3, %s2377_s11  }
  0xaa   : > { %p2029_p1 = scmp.ne.s32.totalorder %s2550_s2, %s2028_s12  ;;  %s2033_s22 = scalar_lea.hbm %s2910_s8, 32 }
  0xab   : > { %p2034_p5 = scmp.lt.u32.totalorder %s2550_s2, %s2910_s8  ;;  %p2035_p10 = scmp.lt.u32.totalorder %s2033_s22, %s2028_s12 }
  0xac   : > { %p2031_p3 = pnand %p2029_p1, %p2383_p11  ;;  %p2037_p6 = scmp.lt.u32.totalorder %s2028_s12, %s2550_s2 }
  0xad   : > { %p2036_p2 = por %p2035_p10, %p2034_p5 }
  0xae   : > { %p2032_p8 = pneg %p2031_p3 }
  0xaf   : > { %p2038_p7 = por %p2037_p6, %p2036_p2 }
  0xb1   : > { %p2039_p12 = pnand %p2038_p7, %p2032_p8 }
  0xb3   : > { %2042 = shalt.err (!%p2039_p12)
}
  0xb4   : > { %s2043_s24 = scalar_lea.vmem %s539_s7, 16  ;;  %s2194_s11 = smov [#allocation10]  }
  0xb5   : > { %p2044_p13 = scmp.ne.s32.totalorder %s539_s7, %s2043_s24  ;;  %s2048_s6 = sshll.u32 %s2194_s11, 4  ;;  %s2049_s6 = int_to_ptr.vmem [resolvable:$false] %s2048_s6 }
  0xb6   : > { %s2050_s3 = scalar_lea.vmem %s2049_s6, 32  ;;  %p2051_p1 = scmp.lt.s32.totalorder %s539_s7, %s2049_s6 }
  0xb7   : > { %p2046_p0 = pnand %p2044_p13, %p2383_p11  ;;  %p2052_p3 = scmp.lt.s32.totalorder %s2050_s3, %s2043_s24 }
  0xb9   : > { %p2047_p4 = pneg %p2046_p0  ;;  %p2053_p9 = por %p2052_p3, %p2051_p1 }
  0xbb   : > { %p2054_p5 = pnand %p2053_p9, %p2047_p4 }
  0xbd   : > { %2057 = shalt.err (!%p2054_p5)
}
  0xbe   : > { %p2912_p10 = scmp.ne.s32.totalorder %s2886_s21, 0  ;;  %p2913_p8 = scmp.ne.s32.totalorder %s2890_s9, 0 }
  0xbf   : > { %s2592_s16 = sand.u32 (!%p2913_p8), 1, %s2164_s29   ;;  %p2914_p11 = scmp.ne.s32.totalorder (!%p2913_p8), %s2898_s20, 0 }
  0xc0   : > { %1784 = dma.hbm_to_vmem [thread:$0]  (!%p2912_p10), %s2550_s2, 16, %s539_s7, %s2424_s10  }
  0xc1   : > { %573 = sbr.rel (%p2913_p8) target bundleno = 2621 (0xa3d), region = 72  ;;  %s1624_s30 = sshll.u32 (!%p2913_p8), %s2592_s16, 3 }
  0xc2   : > { %s576_s15 = scalar_lea.sflag (!%p2913_p8), [#allocation3], %s2592_s16  ;;  %s579_s4 = scalar_lea.vmem (!%p2913_p8), [#allocation2], %s1624_s30 }
  0xc8   : > { %2131 = dma.done.wait (%p2914_p11), %s576_s15, 128  }
  0xc9   : > { %2133 = vsyncadd (%p2914_p11), %s576_s15, 4294967168  ;;  %s2915_s21 = sld [smem:[#allocation28_spill]]  ;;  %s584_s10 = sand.u32 1, %s2445_s1  }
  0xca   : > { %s2602_s9 = sand.u32 1, %s2152_s26   ;;  %s585_s2 = scalar_lea.sflag [#allocation6], %s584_s10 }
  0xcf   : > { %p2916_p9 = scmp.ne.s32.totalorder %s2915_s21, 0 }
  0xd1   : > { %2135 = dma.done.wait (%p2916_p9), %s585_s2, 32  }
  0xd2   : > { %2137 = vsyncadd (%p2916_p9), %s585_s2, 4294967264  ;;  %s601_s20 = scalar_lea.sflag [#allocation9], %s584_s10 }
  0xd3   : > { %2139 = dma.done.wait (%p2916_p9), %s601_s20, 32  }
  0xd4   : > { %2141 = vsyncadd (%p2916_p9), %s601_s20, 4294967264  ;;  %s2917_s1 = sld [smem:[#allocation21_spill]]  ;;  %s2920_s21 = sld [smem:[#allocation34_spill]] }
  0xd5   : > { %s2919_s11 = sld [smem:[#allocation32_spill]]  ;;  %s2921_s0 = sld [smem:[#allocation38_spill]] }
  0xd6   : > { %s2922_s29 = sld [smem:[#allocation40_spill]]  ;;  %s2923_s14 = sld [smem:[#allocation41_spill]] }
  0xd7   : > { %s2924_s3 = sld [smem:[#allocation42_spill]]  ;;  %s2925_s28 = sld [smem:[#allocation43_spill]] }
  0xda   : > { %p702_p2 = scmp.lt.s32.totalorder %s2917_s1, 1  ;;  %p1634_p6 = scmp.ne.s32.totalorder %s2917_s1, 0 }
  0xdb   : > { %v739_v0 = vld [vmem:[%s579_s4] sm:$0xff] (!%p1634_p6)  ;;  %vm740_vm0 = vcmask (!%p1634_p6), 261120  }
  0xdc   : > { %s2617_s7 = scalar_select %p702_p2, %s2917_s1, 1 }
  0xdd   : > { %738 = sbr.rel (%p1634_p6) target bundleno = 229 (0xe5), region = 96 }
  0xde   : > { %s1666_s12 = sshll.u32 %s2617_s7, 4  ;;  %s1669_s27 = sshll.u32 %s2617_s7, 5 }
  0xdf   : > { %s706_s6 = scalar_lea.vmem %s2919_s11, %s1666_s12  ;;  %s2630_s10 = scalar_lea.vmem %s2920_s21, %s1666_s12 }
  0xe0   : > { %s2635_s19 = scalar_lea.vmem %s2921_s0, %s1666_s12  ;;  %s2641_s25 = scalar_lea.vmem %s2922_s29, %s1669_s27 }
  0xe1   : > { %s727_s24 = scalar_lea.vmem %s2923_s14, %s2617_s7  ;;  %s730_s15 = scalar_lea.vmem %s2924_s3, %s2617_s7 }
  0xe2   : > { %s733_s2 = scalar_lea.vmem %s2925_s28, %s2617_s7  ;;  %s611_s0 = scalar_lea.vmem [#allocation10], %s2602_s9 }
  0xe3   : > { %s2656_s12 = scalar_lea.vmem [#allocation11], %s1624_s30 }
  0xe4   : > { %741 = vst.msk [vmem:[%s2656_s12] sm:$0xff] %vm740_vm0, %v739_v0 }
  0xe5 PF: > { %v1886_v1 = vld [vmem:[%s706_s6] sm:$0xff]   ;;  %v2195_v2 = vmov 0.0   ;;  %v1887_v3 = vld [vmem:[%s706_s6 + $0x8] sm:$0xff]   ;;  %vm2196_vm1 = vmmov 0   ;;  %vm767_vm2 = vcmask 261120   ;;  %s2926_s26 = sld [smem:[#allocation33_spill]] }
  0xe6   : > { %1693 = vmatprep.subr.bf16.mxu1 %v2195_v2  ;;  %1707 = vmatprep.subr.bf16.mxu0 %v2195_v2  ;;  %s2197_s29 = smov 112   ;;  %s2198_s30 = smov 96   ;;  %vm819_vm3 = vcmask 130048   ;;  %vm866_vm4 = vcmask 64512   ;;  %vm884_vm5 = vcmask 1043456   ;;  %v1888_v50 = vld [vmem:[%s2630_s10] sm:$0xff]  }
  0xe7   : > { %1694 = vmatpush3.bf16.msra.mxu1 %v1886_v1  ;;  %1697 = vmatprep.mubr.msk.bf16.mxu1 %vm2196_vm1, %v2195_v2  ;;  %s2199_s4 = smov 80   ;;  %s2200_s27 = smov 64   ;;  %v1889_v51 = vld [vmem:[%s2630_s10 + $0x8] sm:$0xff]   ;;  %vm1285_vm6 = vcmask 523264  }
  0xe8   : > { %1695 = vmatprep.subr.bf16.mxu1 %v2195_v2  ;;  %1709 = vmatprep.mubr.msk.bf16.mxu0 %vm2196_vm1, %v2195_v2  ;;  %s2201_s1 = smov 48   ;;  %s2928_s13 = scalar_lea.vmem [#allocation5], %s2602_s9 }
  0xe9   : > { %s2930_s6 = scalar_lea.vmem [#allocation8], %s2602_s9  ;;  %p2937_p12 = scmp.ne.s32.totalorder %s2902_s23, 0 }
  0xeb   : > { %v2665_v4 = vld [vmem:[%s2656_s12] sm:$0xff]  ;;  %1696 = vmatpush3.bf16.msra.mxu1 %v1887_v3  ;;  %s2927_s28 = scalar_lea.vmem %s2926_s26, %s2617_s7  ;;  %s2935_s26 = sld [smem:[#allocation44_spill]] }
  0xec   : > { %v743_v5 = vpack.c.bf16 %v2665_v4, %v2665_v4  ;;  %1701 = vmatprep.subr.bf16.mxu1 %v2195_v2  ;;  %v1635_v6 = vld [vmem:[%s2927_s28] ss:$0 sm:$0xff]  ;;  %s2202_s7 = smov [#allocation11]  }
  0xee   : > { %1698 = vmatmul.mubr.msk.bf16.vlgmr.msra.gmra.mrb[0].mxu1 %vm767_vm2, %v743_v5  ;;  %v1647_v5 = vld [vmem:[%s2928_s13] ss:$0 sm:$0xff] }
  0xef   : > { %1703 = vmatprep.mubr.msk.bf16.mxu1 %vm2196_vm1, %v2195_v2 }
 0x1c1   : > { %v805_v7 = vpop.f32.mrb[0].mxu1 }
 0x1c2   : > { %v806_v8 = vadd.f32 %v1635_v6, %v805_v7  ;;  %v1699_v9 = vpop.f32.mrb[1].mxu1 }
 0x1c3   : > { %v808_v10 = vpop.f32.mrb[2].mxu1 }
 0x1c4   : > { %v815_v11 = vpack.c.bf16 %v806_v8, %v806_v8  ;;  %v1700_v12 = vpop.f32.mrb[3].mxu1 }
 0x1c6   : > { %929 = vrot.lane.b32.xlu1 %v815_v11, %s2197_s29  ;;  %817 = vrot.lane.b32.xlu0 %v815_v11, %s2198_s30 }
 0x1ca   : > { %931 = vrot.lane.b32.xlu0 %v815_v11, %s2199_s4  ;;  %s2936_s4 = smov %s2935_s26 }
 0x238   : > { %v818_v13 = vpop.permute.xlu0 %817  ;;  %v930_v17 = vpop.permute.xlu1 %929 }
 0x239   : > { %v824_v14 = vsel %vm819_vm3, %v818_v13, 0 }
 0x23a   : > { %1702 = vmatpush3.bf16.xpose.msra.mxu1 %v824_v14 }
 0x23b   : > { %1713 = vmatprep.subr.bf16.mxu1 %v2195_v2 }
 0x23c   : > { %v932_v15 = vpop.permute.xlu0 %931 }
 0x23d   : > { %v937_v16 = vsel %vm819_vm3, %v932_v15, 0 }
 0x241   : > { %1704 = vmatmul.mubr.msk.bf16.vlgmr.msra.gmra.mrb[4].mxu1 %vm819_vm3, %v815_v11 }
 0x242   : > { %1714 = vmatpush3.bf16.xpose.msra.mxu1 %v937_v16  ;;  %1715 = vmatprep.mubr.msk.bf16.mxu1 %vm2196_vm1, %v2195_v2 }
 0x243   : > { %1725 = vmatprep.subr.bf16.mxu1 %v2195_v2 }
 0x249   : > { %1716 = vmatmul.mubr.msk.bf16.vlgmr.msra.gmra.mrb[8].mxu1 %vm819_vm3, %v930_v17 }
 0x24a   : > { %1727 = vmatprep.mubr.msk.bf16.mxu1 %vm2196_vm1, %v2195_v2  ;;  %1726 = vmatpush3.bf16.msra.mxu1 %v1889_v51 }
 0x24b   : > { %1737 = vmatprep.subr.bf16.mxu1 %v2195_v2 }
 0x314   : > { %v860_v18 = vpop.f32.mrb[4].mxu1 }
 0x315   : > { %v1705_v19 = vpop.f32.mrb[5].mxu1  ;;  %v867_v20 = vsel %vm866_vm4, %v860_v18, -inf }
 0x316   : > { %868 = vmax.xlane.f32.xlu1 %v867_v20  ;;  %v863_v21 = vpop.f32.mrb[6].mxu1  ;;  %v1891_v19 = vld [vmem:[%s2635_s19 + $0x8] sm:$0xff]  }
 0x317   : > { %v1706_v22 = vpop.f32.mrb[7].mxu1  ;;  %v1893_v20 = vld [vmem:[%s2641_s25 + $0x8] sm:$0xff]  }
 0x31c   : > { %v973_v23 = vpop.f32.mrb[8].mxu1 }
 0x31d   : > { %v1717_v24 = vpop.f32.mrb[9].mxu1  ;;  %v979_v25 = vsel %vm866_vm4, %v973_v23, -inf }
 0x31e   : > { %980 = vmax.xlane.f32.xlu0 %v979_v25  ;;  %v976_v26 = vpop.f32.mrb[10].mxu1 }
 0x31f   : > { %v1718_v27 = vpop.f32.mrb[11].mxu1 }
 0x320   : > { %v1649_v27 = vld [vmem:[%s2930_s6] ss:$0 sm:$0xff] }
 0x3a3   : > { %v869_v28 = vpop.xlane.xlu1 %868 }
 0x3a4   : > { %v870_v29 = vsub.f32 %v860_v18, %v869_v28  ;;  %v1890_v18 = vld [vmem:[%s2635_s19] sm:$0xff]   ;;  %s2929_s19 = scalar_lea.vmem [#allocation7], %s2602_s9  ;;  %s2932_s9 = sld [smem:[#allocation22_spill]] }
 0x3a5   : > { %v1648_v25 = vld [vmem:[%s2929_s19] ss:$0 sm:$0xff] }
 0x3a6   : > { %v871_v30 = vmul.f32 1.442695, %v870_v29 }
 0x3a8   : > { %1896 = vpow2.f32 %v871_v30 }
 0x3aa   : > { %s1663_s21 = sshll.u32 %s2932_s9, 7 }
 0x3ab   : > { %v981_v31 = vpop.xlane.xlu0 %980  ;;  %s2757_s28 = scalar_lea.hbm %s2935_s26, %s1663_s21 }
 0x3ac   : > { %v982_v32 = vsub.f32 %v973_v23, %v981_v31  ;;  %v1894_v31 = vld [vmem:[%s2641_s25 + $0x10] sm:$0xff]  }
 0x3ae   : > { %v983_v33 = vmul.f32 1.442695, %v982_v32  ;;  %v1895_v32 = vld [vmem:[%s2641_s25 + $0x18] sm:$0xff]  }
 0x3b0   : > { %1898 = vpow2.f32 %v983_v33  ;;  %v1650_v33 = vld [vmem:[%s611_s0] ss:$0 sm:$0xff]  ;;  %s1374_s0 = sshll.u32 %s2656_s12, 4  ;;  %s2759_s0 = int_to_ptr.vmem [resolvable:$true] %s1374_s0 }
 0x3b1   : > { %s2058_s29 = scalar_lea.vmem %s2759_s0, 128 }
 0x3b2   : > { %v1897_v34 = vpop.eup %1896  ;;  %p2059_p7 = scmp.ne.s32.totalorder %s2759_s0, %s2058_s29 }
 0x3b3   : > { %v873_v35 = vsel %vm866_vm4, %v1897_v34, 0.0 }
 0x3b4   : > { %874 = vadd.xlane.f32.xlu0 %v873_v35  ;;  %p2060_p13 = pnand %p2059_p7, %p2937_p12 }
 0x3b6   : > { %p2061_p0 = pneg %p2060_p13 }
 0x3ba   : > { %v1899_v36 = vpop.eup %1898 }
 0x3bb   : > { %v985_v37 = vsel %vm866_vm4, %v1899_v36, 0.0 }
 0x3bc   : > { %986 = vadd.xlane.f32.xlu1 %v985_v37 }
 0x3ca   : > { %879 = vrot.lane.b32.xlu0 %v815_v11, %s2200_s27 }
 0x3cd   : > { %991 = vrot.lane.b32.xlu1 %v815_v11, %s2201_s1 }
 0x441   : > { %v875_v38 = vpop.xlane.xlu0 %874 }
 0x442   : > { %1900 = vrcp.f32 %v875_v38 }
 0x445   : > { %v880_v39 = vpop.permute.xlu0 %879 }
 0x446   : > { %v886_v40 = vsel %vm884_vm5, %v880_v39, 0 }
 0x447   : > { %1708 = vmatpush3.bf16.msra.mxu0 %v886_v40 }
 0x448   : > { %1719 = vmatprep.subr.bf16.mxu0 %v2195_v2 }
 0x449   : > { %v987_v41 = vpop.xlane.xlu1 %986 }
 0x44a   : > { %1902 = vrcp.f32 %v987_v41  ;;  %v1654_v41 = vld [vmem:[%s727_s24] ss:$0 sm:$0xff] }
 0x44c   : > { %v1901_v42 = vpop.eup %1900 }
 0x44d   : > { %v877_v43 = vmul.f32 %v1901_v42, %v1897_v34  ;;  %v992_v44 = vpop.permute.xlu1 %991 }
 0x44e   : > { %v997_v46 = vsel %vm884_vm5, %v992_v44, 0 }
 0x44f   : > { %v878_v45 = vpack.c.bf16 %v877_v43, %v877_v43 }
 0x451   : > { %1710 = vmatmul.mubr.msk.bf16.vlgmr.msra.gmra.mrb[0].mxu0 %vm866_vm4, %v878_v45 }
 0x452   : > { %1720 = vmatpush3.bf16.msra.mxu0 %v997_v46  ;;  %1721 = vmatprep.mubr.msk.bf16.mxu0 %vm2196_vm1, %v2195_v2 }
 0x453   : > { %1731 = vmatprep.subr.bf16.mxu0 %v2195_v2 }
 0x454   : > { %v1903_v47 = vpop.eup %1902 }
 0x455   : > { %v989_v48 = vmul.f32 %v1903_v47, %v1899_v36 }
 0x457   : > { %v990_v49 = vpack.c.bf16 %v989_v48, %v989_v48 }
 0x459   : > { %1722 = vmatmul.mubr.msk.bf16.vlgmr.msra.gmra.mrb[4].mxu0 %vm866_vm4, %v990_v49 }
 0x45a   : > { %1733 = vmatprep.mubr.msk.bf16.mxu0 %vm2196_vm1, %v2195_v2  ;;  %1732 = vmatpush3.bf16.msra.mxu0 %v1888_v50 }
 0x45b   : > { %1745 = vmatprep.subr.bf16.mxu0 %v2195_v2 }
 0x524   : > { %v922_v52 = vpop.f32.mrb[0].mxu0 }
 0x525   : > { %v928_v53 = vpack.c.bf16 %v922_v52, %v922_v52  ;;  %v1711_v54 = vpop.f32.mrb[1].mxu0 }
 0x526   : > { %v925_v55 = vpop.f32.mrb[2].mxu0 }
 0x527   : > { %v1712_v56 = vpop.f32.mrb[3].mxu0  ;;  %1734 = vmatmul.mubr.msk.bf16.vlgmr.msra.gmra.mrb[8].mxu0 %vm819_vm3, %v928_v53 }
 0x528   : > { %1753 = vmatprep.mubr.msk.bf16.mxu0 %vm2196_vm1, %v2195_v2 }
 0x52c   : > { %v1033_v57 = vpop.f32.mrb[4].mxu0 }
 0x52d   : > { %v1039_v58 = vpack.c.bf16 %v1033_v57, %v1033_v57  ;;  %v1723_v59 = vpop.f32.mrb[5].mxu0  ;;  %v1660_v57 = vld [vmem:[%s730_s15] ss:$0 sm:$0xff]  ;;  %s1361_s15 = scalar_lea.sflag [#allocation4], %s2592_s16 }
 0x52e   : > { %v1036_v60 = vpop.f32.mrb[6].mxu0  ;;  %v1661_v59 = vld [vmem:[%s733_s2] ss:$0 sm:$0xff]  ;;  %s2062_s2 = sshll.u32 %s2202_s7, 4  ;;  %s2063_s2 = int_to_ptr.vmem [resolvable:$false] %s2062_s2 }
 0x52f   : > { %v1724_v61 = vpop.f32.mrb[7].mxu0  ;;  %1728 = vmatmul.mubr.msk.bf16.vlgmr.msra.gmra.mrb[12].mxu1 %vm819_vm3, %v1039_v58  ;;  %s2064_s30 = scalar_lea.vmem %s2063_s2, 256  ;;  %p2065_p4 = scmp.lt.s32.totalorder %s2759_s0, %s2063_s2 }
 0x530   : > { %1741 = vmatprep.mubr.msk.bf16.mxu1 %vm2196_vm1, %v2195_v2  ;;  %1738 = vmatpush3.bf16.msra.mxu1 %v1890_v18  ;;  %p2066_p1 = scmp.lt.s32.totalorder %s2064_s30, %s2058_s29 }
 0x531   : > { %1739 = vmatprep.subr.bf16.mxu1 %v2195_v2 }
 0x532   : > { %p2067_p3 = por %p2066_p1, %p2065_p4 }
 0x534   : > { %1740 = vmatpush3.bf16.msra.mxu1 %v1891_v19  ;;  %p2068_p5 = pnand %p2067_p3, %p2061_p0 }
 0x5fa   : > { %v1132_v62 = vpop.f32.mrb[8].mxu0 }
 0x5fb   : > { %v1735_v63 = vpop.f32.mrb[9].mxu0 }
 0x5fc   : > { %v1135_v0 = vpop.f32.mrb[10].mxu0 }
 0x5fd   : > { %v1736_v1 = vpop.f32.mrb[11].mxu0 }
 0x602   : > { %v1083_v3 = vpop.f32.mrb[12].mxu1 }
 0x603   : > { %v1133_v6 = vadd.f32 %v1132_v62, %v1083_v3  ;;  %v1729_v7 = vpop.f32.mrb[13].mxu1 }
 0x604   : > { %v1086_v8 = vpop.f32.mrb[14].mxu1 }
 0x605   : > { %v1145_v9 = vadd.f32 %v1647_v5, %v1133_v6  ;;  %v1730_v10 = vpop.f32.mrb[15].mxu1 }
 0x607   : > { %v1146_v11 = vadd.f32 %v1145_v9, %v2665_v4  ;;  %v1892_v4 = vld [vmem:[%s2641_s25] sm:$0xff]  }
 0x608   : > { %1746 = vmatpush3.bf16.msra.mxu0 %v1892_v4 }
 0x609   : > { %v1147_v12 = vsel %vm767_vm2, %v1146_v11, 0.0  ;;  %1747 = vmatprep.subr.bf16.mxu0 %v2195_v2 }
 0x60a   : > { %1148 = vadd.xlane.f32.xlu1 %v1147_v12 }
 0x60c   : > { %1748 = vmatpush3.bf16.msra.mxu0 %v1893_v20 }
 0x60d   : > { %1749 = vmatprep.subr.bf16.mxu0 %v2195_v2 }
 0x610   : > { %1750 = vmatpush3.bf16.msra.mxu0 %v1894_v31 }
 0x611   : > { %1751 = vmatprep.subr.bf16.mxu0 %v2195_v2 }
 0x614   : > { %1752 = vmatpush3.bf16.msra.mxu0 %v1895_v32 }
 0x697   : > { %v1149_v13 = vpop.xlane.xlu1 %1148 }
 0x698   : > { %v1151_v14 = vmul.f32 0.03125, %v1149_v13 }
 0x69a   : > { %v1152_v15 = vsub.f32 %v1146_v11, %v1151_v14 }
 0x69c   : > { %v1153_v16 = vmul.f32 %v1152_v15, %v1152_v15 }
 0x69e   : > { %v1154_v17 = vsel %vm767_vm2, %v1153_v16, 0.0 }
 0x69f   : > { %1155 = vadd.xlane.f32.xlu0 %v1154_v17 }
 0x72c   : > { %v1156_v21 = vpop.xlane.xlu0 %1155 }
 0x72d   : > { %v1157_v22 = vmul.f32 0.03125, %v1156_v21 }
 0x72f   : > { %v1158_v23 = vadd.f32 1e-06, %v1157_v22 }
 0x731   : > { %1904 = vrsqrt.f32 %v1158_v23 }
 0x73b   : > { %v1905_v24 = vpop.eup %1904 }
 0x73c   : > { %v1160_v26 = vmul.f32 %v1905_v24, %v1152_v15 }
 0x73e   : > { %v1168_v28 = vmul.f32 %v1648_v25, %v1160_v26 }
 0x740   : > { %v1176_v29 = vadd.f32 %v1649_v27, %v1168_v28 }
 0x742   : > { %v1177_v30 = vpack.c.bf16 %v1176_v29, %v1176_v29 }
 0x744   : > { %1742 = vmatmul.mubr.msk.bf16.vlgmr.msra.gmra.mrb[16].mxu1 %vm767_vm2, %v1177_v30 }
 0x817   : > { %v1238_v34 = vpop.f32.mrb[16].mxu1 }
 0x818   : > { %v1239_v35 = vadd.f32 %v1650_v33, %v1238_v34  ;;  %v1743_v36 = vpop.f32.mrb[17].mxu1 }
 0x819   : > { %v1241_v37 = vpop.f32.mrb[18].mxu1 }
 0x81a   : > { %v1244_v38 = vmax.f32 %v1239_v35, 0.0  ;;  %v1744_v39 = vpop.f32.mrb[19].mxu1 }
 0x81c   : > { %v1245_v40 = vpack.c.bf16 %v1244_v38, %v1244_v38 }
 0x81e   : > { %1754 = vmatmul.mubr.msk.bf16.vlgmr.msra.gmra.mrb[12].mxu0 %vm1285_vm6, %v1245_v40 }
 0x8f1   : > { %v1323_v42 = vpop.f32.mrb[12].mxu0 }
 0x8f2   : > { %v1324_v2 = vadd.f32 %v1654_v41, %v1323_v42  ;;  %v1755_v43 = vpop.f32.mrb[13].mxu0 }
 0x8f3   : > { %v1326_v44 = vpop.f32.mrb[14].mxu0 }
 0x8f4   : > { %v1756_v45 = vpop.f32.mrb[15].mxu0  ;;  %v1329_v46 = vadd.f32 %v1324_v2, %v1176_v29 }
 0x8f6   : > { %v1330_v47 = vsel %vm767_vm2, %v1329_v46, 0.0 }
 0x8f7   : > { %1331 = vadd.xlane.f32.xlu0 %v1330_v47 }
 0x984   : > { %v1332_v48 = vpop.xlane.xlu0 %1331 }
 0x985   : > { %v1333_v49 = vmul.f32 0.03125, %v1332_v48 }
 0x987   : > { %v1334_v50 = vsub.f32 %v1329_v46, %v1333_v49 }
 0x989   : > { %v1335_v51 = vmul.f32 %v1334_v50, %v1334_v50 }
 0x98b   : > { %v1336_v52 = vsel %vm767_vm2, %v1335_v51, 0.0 }
 0x98c   : > { %1337 = vadd.xlane.f32.xlu1 %v1336_v52 }
 0xa19   : > { %v1338_v53 = vpop.xlane.xlu1 %1337 }
 0xa1a   : > { %v1339_v54 = vmul.f32 0.03125, %v1338_v53 }
 0xa1c   : > { %v1340_v55 = vadd.f32 1e-06, %v1339_v54 }
 0xa1e   : > { %1906 = vrsqrt.f32 %v1340_v55 }
 0xa28   : > { %v1907_v56 = vpop.eup %1906 }
 0xa29   : > { %v1342_v58 = vmul.f32 %v1907_v56, %v1334_v50 }
 0xa2b   : > { %v1350_v60 = vmul.f32 %v1660_v57, %v1342_v58 }
 0xa2d   : > { %v1358_v61 = vadd.f32 %v1661_v59, %v1350_v60 }
 0xa2f   : > { %1359 = vst.msk [vmem:[%s2656_s12] sm:$0xff] %vm767_vm2, %v1358_v61 }
 0xa30   : > { %2071 = shalt.err (!%p2068_p5)
}
 0xa31   : > { %s2072_s16 = scalar_lea.hbm %s2757_s28, 128  ;;  %s2076_s1 = scalar_lea.hbm %s2936_s4, 256 }
 0xa32   : > { %p2073_p10 = scmp.ne.s32.totalorder %s2757_s28, %s2072_s16  ;;  %p2077_p9 = scmp.lt.u32.totalorder %s2757_s28, %s2936_s4 }
 0xa33   : > { %p2078_p2 = scmp.lt.u32.totalorder %s2076_s1, %s2072_s16  ;;  %p2080_p7 = scmp.lt.u32.totalorder %s2072_s16, %s2757_s28 }
 0xa34   : > { %p2074_p8 = pnand %p2073_p10, %p2937_p12 }
 0xa35   : > { %p2079_p6 = por %p2078_p2, %p2077_p9 }
 0xa36   : > { %p2075_p11 = pneg %p2074_p8 }
 0xa37   : > { %p2081_p13 = por %p2080_p7, %p2079_p6 }
 0xa39   : > { %p2082_p0 = pnand %p2081_p13, %p2075_p11 }
 0xa3b   : > { %2085 = shalt.err (!%p2082_p0)
}
 0xa3c   : > { %1767 = dma.vmem_to_hbm [thread:$0]  (%p2937_p12), %s2759_s0, 128, %s2757_s28, %s1361_s15  }
 0xa3d PF: > { %s2938_s6 = sld [smem:[#allocation18_spill]]  ;;  %s2939_s10 = sld [smem:[#allocation30_spill]] }
 0xa3e   : > { %p1790_p4 = scmp.ge.s32.totalorder %s2188_s18, 2 }
 0xa43   : > { %s1386_s20 = sand.u32 1, %s2938_s6   ;;  %p2940_p1 = scmp.ne.s32.totalorder %s2939_s10, 0 }
 0xa44   : > { %s1387_s17 = scalar_lea.sflag [#allocation4], %s1386_s20 }
 0xa45   : > { %p1786_p3 = pnand %p1790_p4, %p2940_p1 }
 0xa47   : > { %2143 = dma.done.wait (!%p1786_p3), %s1387_s17, 128  }
 0xa48   : > { %2145 = vsyncadd (!%p1786_p3), %s1387_s17, 4294967168  ;;  %s35_s18 = sadd.s32 1, %s2188_s18   ;;  %s2941_s25 = sld [smem:[#allocation16_spill]] }
 0xa49   : > { %p32_p5 = scmp.ge.s32.totalorder %s35_s18, 6   ;;  %s2942_s26 = sld [smem:[#allocation17_spill]] }
 0xa4a   : > { %s2943_s27 = sld [smem:[#allocation26_spill]]  ;;  %s2944_s28 = sld [smem:[#allocation19_spill]] }
 0xa4b   : > { %s2945_s29 = sld [smem:[#allocation20_spill]]  ;;  %s2946_s30 = sld [smem:[#allocation29_spill]] }
 0xa4c   : > { %s2947_s14 = sld [smem:[#allocation23_spill]]  ;;  %s2948_s15 = sld [smem:[#allocation24_spill]] }
 0xa4d   : > { %s2949_s16 = sld [smem:[#allocation25_spill]]  ;;  %s2950_s17 = sld [smem:[#allocation27_spill]] }
 0xa4e   :  { %34 = sbr.rel (!%p32_p5) target bundleno = 28 (0x1c), region = 193 }
 0xa55   :  { %1392 = vsyncpa [#allocation3], 1 }
 0xa56   :  { %1394 = vsyncpa [#allocation3 + $0x1], 1 }
 0xa57   :  { %1395 = vsyncpa [#allocation6], 1 }
 0xa58   :  { %1397 = vsyncpa [#allocation6 + $0x1], 1 }
 0xa59   :  { %1398 = vsyncpa [#allocation9], 1 }
 0xa5a   :  { %1400 = vsyncpa [#allocation9 + $0x1], 1 }
 0xa5b   :  { %1401 = vsyncpa [#allocation4], 1 }
 0xa5c   :  { %1403 = vsyncpa [#allocation4 + $0x1], 1 }

</bundles_post_ra>
